<compile_context>
chip_gen: v6e
topology: v6e:2x2x1
jax: 0.10.0
libtpu: 0.0.40
codegen_flags: <defaults>
</compile_context>

<pallas_src>
import numpy as np
import jax
import jax.numpy as jnp
from jax.experimental import pallas as pl
from jax.experimental.pallas import tpu as pltpu


# ----------------------------------------------------------------------------
# Parameter init (deterministic, PyTorch Conv2d-style uniform(+-1/sqrt(fan_in)))
# ----------------------------------------------------------------------------
def init_encoder_params(key, input_channels, num_filters, no_convs_per_block):
    params = []
    cin = input_channels
    for out_dim in num_filters:
        block = []
        for _ in range(no_convs_per_block):
            key, kw, kb = jax.random.split(key, 3)
            bound = float(1.0 / (cin * 9) ** 0.5)
            w = jax.random.uniform(kw, (out_dim, cin, 3, 3), jnp.float32, -bound, bound)
            b = jax.random.uniform(kb, (out_dim,), jnp.float32, -bound, bound)
            block.append((w, b))
            cin = out_dim
        params.append(block)
    return params


# ----------------------------------------------------------------------------
# Host-side constant builders
# ----------------------------------------------------------------------------
def _banded_conv_weights(w_oihw, W):
    """3x3 SAME conv as 3 banded matmuls over rows of an UNPADDED (W*Ci) lane layout.

    Returns (3, W*Ci, W*Co) with
        out_row[r] = sum_dy  src_padded_row[r + dy] @ Wb[dy]
    where src is the per-image H-padded stack; out-of-range W taps are simply
    omitted (== SAME padding on the W axis, no lane halo anywhere).
    """
    k = np.asarray(w_oihw, np.float32)              # (Co, Ci, 3, 3) — PyTorch layout
    Co, Ci = k.shape[0], k.shape[1]
    wb = np.zeros((3, W * Ci, W * Co), np.float32)
    for dy in range(3):
        for dx in range(3):
            kt = k[:, :, dy, dx].T                  # (Ci, Co)
            for wo in range(W):
                wi = wo + dx - 1
                if 0 <= wi < W:
                    wb[dy, wi * Ci:(wi + 1) * Ci, wo * Co:(wo + 1) * Co] = kt
    return jnp.asarray(wb)


def _bias_row(b, W):
    b = np.asarray(b, np.float32)
    return jnp.asarray(np.tile(b, W)[None, :])      # (1, W*Co), lane-dense


def _band_mask(B, Hp, Hvalid):
    """(band,1) mask: 1 on valid image rows of the stacked band, 0 on the
    garbage rows that fall between stacked images."""
    band = B * Hp - 2
    m = np.zeros((band, 1), np.float32)
    for r in range(band):
        if (r % Hp) < Hvalid:
            m[r, 0] = 1.0
    return jnp.asarray(m)


def _pool_row_mat(B, Hin):
    """Block-diagonal-per-image 2x row pool that reads the stacked conv band
    (garbage rows get weight 0) and writes directly into the padded layout of
    the next conv's input (halo rows are all-zero rows of the matrix)."""
    Hp_in = Hin + 2
    Ho = Hin // 2
    Hp_out = Ho + 2
    band = B * Hp_in - 2
    R = np.zeros((B * Hp_out, band), np.float32)
    for b in range(B):
        for ho in range(Ho):
            for k in (0, 1):
                R[b * Hp_out + 1 + ho, b * Hp_in + 2 * ho + k] = 0.5
    return jnp.asarray(R)


def _pool_lane_mat(Win, C):
    """2x lane pool: (w, c) -> (w//2, c) with 0.5 weights (0.25 total with R)."""
    Wo = Win // 2
    P = np.zeros((Win * C, Wo * C), np.float32)
    for wo in range(Wo):
        for d in (0, 1):
            for c in range(C):
                P[(2 * wo + d) * C + c, wo * C + c] = 0.5
    return jnp.asarray(P)


def _select_mat(B, Hvalid):
    """Compacts the final conv's stacked band (with garbage rows) to the dense
    (B*Hvalid, lanes) output block via one tiny MXU matmul."""
    Hp_in = Hvalid + 2
    band = B * Hp_in - 2
    S = np.zeros((B * Hvalid, band), np.float32)
    for b in range(B):
        for h in range(Hvalid):
            S[b * Hvalid + h, b * Hp_in + h] = 1.0
    return jnp.asarray(S)


# ----------------------------------------------------------------------------
# Fused encoder builder
# ----------------------------------------------------------------------------
def make_encoder_forward(params, input_channels, num_filters, no_convs_per_block,
                         H, W, batch_tile=8):
    B = int(batch_tile)

    # ---- static plan --------------------------------------------------------
    flat = [wb for block in params for wb in block]
    plan = []
    cur_C, cur_H, cur_W = input_channels, H, W
    ci = 0
    for i in range(len(num_filters)):
        if i != 0:
            # TODO(synk): AvgPool2d ceil_mode=True with odd H/W is not handled.
            assert cur_H % 2 == 0 and cur_W % 2 == 0, "odd spatial dims unsupported"
            plan.append(dict(kind="pool", Hin=cur_H, Win=cur_W, C=cur_C))
            cur_H //= 2
            cur_W //= 2
        for _ in range(no_convs_per_block):
            Co = num_filters[i]
            plan.append(dict(kind="conv", H=cur_H, W=cur_W, Ci=cur_C, Co=Co,
                             w=flat[ci][0], b=flat[ci][1]))
            cur_C = Co
            ci += 1
    H_out, W_out, C_out = cur_H, cur_W, cur_C
    assert plan[-1]["kind"] == "conv"

    for idx, op in enumerate(plan):
        op["next"] = plan[idx + 1]["kind"] if idx + 1 < len(plan) else None

    # ---- constant operands, specs, VMEM scratch -----------------------------
    consts, const_specs, scratch_shapes = [], [], []

    def add_const(arr):
        arr = jnp.asarray(arr, jnp.float32)
        idx = len(consts)
        consts.append(arr)
        nd = arr.ndim
        const_specs.append(pl.BlockSpec(arr.shape, lambda g, _nd=nd: (0,) * _nd))
        return idx

    for op in plan:
        if op["kind"] == "conv":
            op["c_wb"] = add_const(_banded_conv_weights(op["w"], op["W"]))
            op["c_b"] = add_const(_bias_row(op["b"], op["W"]))
            if op["next"] == "conv":
                op["c_mask"] = add_const(_band_mask(B, op["H"] + 2, op["H"]))
                op["scratch"] = len(scratch_shapes)
                scratch_shapes.append(
                    pltpu.VMEM((B * (op["H"] + 2), op["W"] * op["Co"]), jnp.float32))
            elif op["next"] is None:
                op["c_sel"] = add_const(_select_mat(B, op["H"]))
        else:  # pool
            op["c_R"] = add_const(_pool_row_mat(B, op["Hin"]))
            op["c_P"] = add_const(_pool_lane_mat(op["Win"], op["C"]))
            op["scratch"] = len(scratch_shapes)
            scratch_shapes.append(
                pltpu.VMEM((B * (op["Hin"] // 2 + 2), (op["Win"] // 2) * op["C"]),
                           jnp.float32))
    n_consts = len(consts)

    # ---- fused kernel: whole encoder for one batch tile ---------------------
    def kernel(*refs):
        x_ref = refs[0]
        cref = refs[1:1 + n_consts]
        o_ref = refs[1 + n_consts]
        scratch = refs[2 + n_consts:]

        # Zero ONLY the two scratch rows (global first/last halo) that per-step
        # stores never touch.  Done every step (4 single-row 128-lane stores):
        # correct even if the "parallel" grid is sharded across TensorCores.
        for op in plan:
            if op["kind"] == "conv" and op["next"] == "conv":
                sref = scratch[op["scratch"]]
                rows, cols = sref.shape
                z = jnp.zeros((1, cols), jnp.float32)
                sref[0:1, :] = z
                sref[rows - 1:rows, :] = z

        src = x_ref          # ref holding the per-image H-padded stacked layout
        pend = None          # conv activation (stacked band) awaiting a pool
        for op in plan:
            if op["kind"] == "conv":
                Hp = op["H"] + 2
                band = B * Hp - 2
                nout = op["W"] * op["Co"]
                wb_ref = cref[op["c_wb"]]
                # bias folded into the accumulator init (saves a full-tile add)
                acc = jnp.broadcast_to(cref[op["c_b"]][...], (band, nout))
                for dy in range(3):      # 3 banded matmuls, M = B*(H+2)-2 rows
                    acc = acc + jnp.dot(src[dy:dy + band, :], wb_ref[dy],
                                        preferred_element_type=jnp.float32)
                act = jnp.maximum(acc, 0.0)                    # fused ReLU
                if op["next"] == "conv":
                    # zero the image-boundary garbage rows, store interior rows
                    sref = scratch[op["scratch"]]
                    sref[1:1 + band, :] = act * cref[op["c_mask"]][...]
                    src = sref
                elif op["next"] == "pool":
                    pend = act            # consumed immediately by the pool
                else:                     # final conv -> compact + write output
                    o_ref[...] = jnp.dot(
                        cref[op["c_sel"]][...], act,
                        preferred_element_type=jnp.float32).astype(o_ref.dtype)
            else:                         # 2x2 stride-2 average pool, on the MXU
                pooled = jnp.dot(cref[op["c_R"]][...], pend,
                                 preferred_element_type=jnp.float32)
                pooled = jnp.dot(pooled, cref[op["c_P"]][...],
                                 preferred_element_type=jnp.float32)
                sref = scratch[op["scratch"]]
                sref[...] = pooled        # full aligned store, halos written 0
                src = sref
                pend = None

    Hp0 = H + 2
    lanes_in = W * input_channels
    lanes_out = W_out * C_out

    def forward(x_nchw):
        N = x_nchw.shape[0]
        Np = ((N + B - 1) // B) * B
        grid0 = Np // B
        # (8,128) block constraints when the grid has more than one step.
        assert (B * Hp0) % 8 == 0 or grid0 == 1
        assert (B * H_out) % 8 == 0 or grid0 == 1

        x = jnp.transpose(x_nchw, (0, 2, 3, 1))                   # NCHW -> NHWC
        x = jnp.pad(x, ((0, Np - N), (1, 1), (0, 0), (0, 0)))     # batch + H halo
        x = x.reshape(Np * Hp0, lanes_in)                         # lane-dense rows

        out2d = pl.pallas_call(
            kernel,
            out_shape=jax.ShapeDtypeStruct((Np * H_out, lanes_out), jnp.float32),
            grid=(grid0,),
            in_specs=[pl.BlockSpec((B * Hp0, lanes_in), lambda g: (g, 0))] + const_specs,
            out_specs=pl.BlockSpec((B * H_out, lanes_out), lambda g: (g, 0)),
            scratch_shapes=scratch_shapes,
            compiler_params=pltpu.CompilerParams(
                dimension_semantics=("parallel",),   # >=2 steps shard across v7x TCs
                vmem_limit_bytes=32 * 1024 * 1024),
        )(x, *consts)

        out = out2d.reshape(Np, H_out, W_out, C_out)[:N]
        # TODO(synk): a consumer taking NHWC could skip this final transpose.
        return jnp.transpose(out, (0, 3, 1, 2))                   # NHWC -> NCHW

    return forward


# ----------------------------------------------------------------------------
# Pure-JAX reference (for correctness check)
# ----------------------------------------------------------------------------
def encoder_forward_ref(x_nchw, params):
    x = jnp.transpose(x_nchw, (0, 2, 3, 1))
    for i, block in enumerate(params):
        if i != 0:
            x = jax.lax.reduce_window(x, 0.0, jax.lax.add,
                                      (1, 2, 2, 1), (1, 2, 2, 1), "VALID") * 0.25
        for (w, b) in block:
            x = jax.lax.conv_general_dilated(
                x, jnp.transpose(w, (2, 3, 1, 0)),
                window_strides=(1, 1), padding="SAME",
                dimension_numbers=("NHWC", "HWIO", "NHWC"))
            x = jax.nn.relu(x + b[None, None, None, :])
    return jnp.transpose(x, (0, 3, 1, 2))


if __name__ == "__main__":
    key = jax.random.PRNGKey(0)
    kx, kp = jax.random.split(key)

    N, Cin, Hs, Ws = 16, 4, 16, 16
    num_filters = (8, 16)
    no_convs_per_block = 2

    x = jax.random.normal(kx, (N, Cin, Hs, Ws), dtype=jnp.float32)
    params = init_encoder_params(kp, Cin, num_filters, no_convs_per_block)

    # batch_tile=8 -> M = 8*(16+2)-2 = 142 per banded matmul, grid=(2,) so both
    # v7x TensorCores get a step; single TC chips just loop twice.
    forward = jax.jit(make_encoder_forward(params, Cin, num_filters,
                                           no_convs_per_block, Hs, Ws,
                                           batch_tile=8))
    out = jax.block_until_ready(forward(x))
    ref = jax.block_until_ready(encoder_forward_ref(x, params))

    assert out.shape == (N, num_filters[-1], Hs // 2, Ws // 2), out.shape
    err = float(jnp.max(jnp.abs(out - ref)))
    assert jnp.allclose(out, ref, rtol=1e-3, atol=1e-3), err
    print("KERNEL_OK")
</pallas_src>

<mosaic_0001>
module attributes {stable_mosaic.version = 11 : i64} {
  func.func @kernel(%arg0: i32, %arg1: memref<144x64xf32, #tpu.memory_space<vmem>>, %arg2: memref<3x64x128xf32, #tpu.memory_space<vmem>>, %arg3: memref<1x128xf32, #tpu.memory_space<vmem>>, %arg4: memref<142x1xf32, #tpu.memory_space<vmem>>, %arg5: memref<3x128x128xf32, #tpu.memory_space<vmem>>, %arg6: memref<1x128xf32, #tpu.memory_space<vmem>>, %arg7: memref<80x142xf32, #tpu.memory_space<vmem>>, %arg8: memref<128x64xf32, #tpu.memory_space<vmem>>, %arg9: memref<3x64x128xf32, #tpu.memory_space<vmem>>, %arg10: memref<1x128xf32, #tpu.memory_space<vmem>>, %arg11: memref<78x1xf32, #tpu.memory_space<vmem>>, %arg12: memref<3x128x128xf32, #tpu.memory_space<vmem>>, %arg13: memref<1x128xf32, #tpu.memory_space<vmem>>, %arg14: memref<64x78xf32, #tpu.memory_space<vmem>>, %arg15: memref<64x128xf32, #tpu.memory_space<vmem>>, %arg16: memref<144x128xf32, #tpu.memory_space<vmem>>, %arg17: memref<80x64xf32, #tpu.memory_space<vmem>>, %arg18: memref<80x128xf32, #tpu.memory_space<vmem>>) attributes {dimension_semantics = [#tpu.dimension_semantics<parallel>], iteration_bounds = array<i64: 2>, scalar_prefetch = 0 : i64, scratch_operands = 3 : i64, tpu.core_type = #tpu.core_type<tc>, window_params = [{transform_indices = @transform_0, window_bounds = array<i64: 144, 64>}, {pipeline_mode = #tpu.pipeline_mode<synchronous>, transform_indices = @transform_1, window_bounds = array<i64: 3, 64, 128>}, {pipeline_mode = #tpu.pipeline_mode<synchronous>, transform_indices = @transform_2, window_bounds = array<i64: 1, 128>}, {pipeline_mode = #tpu.pipeline_mode<synchronous>, transform_indices = @transform_3, window_bounds = array<i64: 142, 1>}, {pipeline_mode = #tpu.pipeline_mode<synchronous>, transform_indices = @transform_4, window_bounds = array<i64: 3, 128, 128>}, {pipeline_mode = #tpu.pipeline_mode<synchronous>, transform_indices = @transform_5, window_bounds = array<i64: 1, 128>}, {pipeline_mode = #tpu.pipeline_mode<synchronous>, transform_indices = @transform_6, window_bounds = array<i64: 80, 142>}, {pipeline_mode = #tpu.pipeline_mode<synchronous>, transform_indices = @transform_7, window_bounds = array<i64: 128, 64>}, {pipeline_mode = #tpu.pipeline_mode<synchronous>, transform_indices = @transform_8, window_bounds = array<i64: 3, 64, 128>}, {pipeline_mode = #tpu.pipeline_mode<synchronous>, transform_indices = @transform_9, window_bounds = array<i64: 1, 128>}, {pipeline_mode = #tpu.pipeline_mode<synchronous>, transform_indices = @transform_10, window_bounds = array<i64: 78, 1>}, {pipeline_mode = #tpu.pipeline_mode<synchronous>, transform_indices = @transform_11, window_bounds = array<i64: 3, 128, 128>}, {pipeline_mode = #tpu.pipeline_mode<synchronous>, transform_indices = @transform_12, window_bounds = array<i64: 1, 128>}, {pipeline_mode = #tpu.pipeline_mode<synchronous>, transform_indices = @transform_13, window_bounds = array<i64: 64, 78>}, {transform_indices = @transform_14, window_bounds = array<i64: 64, 128>}]} {
    %cst = arith.constant 0.000000e+00 : f32
    %0 = vector.broadcast %cst : f32 to vector<1x128xf32>
    %c0 = arith.constant 0 : index
    %c0_0 = arith.constant 0 : index
    %1 = vector.load %arg16[%c0, %c0_0] : memref<144x128xf32, #tpu.memory_space<vmem>>, vector<1x128xf32>
    tpu.vector_store %arg16[%c0, %c0_0], %0 {strides = array<i32>} : memref<144x128xf32, #tpu.memory_space<vmem>>, vector<1x128xf32>,
    %c143 = arith.constant 143 : index
    %c0_1 = arith.constant 0 : index
    %2 = vector.load %arg16[%c143, %c0_1] : memref<144x128xf32, #tpu.memory_space<vmem>>, vector<1x128xf32>
    tpu.vector_store %arg16[%c143, %c0_1], %0 {strides = array<i32>} : memref<144x128xf32, #tpu.memory_space<vmem>>, vector<1x128xf32>,
    %cst_2 = arith.constant 0.000000e+00 : f32
    %3 = vector.broadcast %cst_2 : f32 to vector<1x128xf32>
    %c0_3 = arith.constant 0 : index
    %c0_4 = arith.constant 0 : index
    %4 = vector.load %arg18[%c0_3, %c0_4] : memref<80x128xf32, #tpu.memory_space<vmem>>, vector<1x128xf32>
    tpu.vector_store %arg18[%c0_3, %c0_4], %3 {strides = array<i32>} : memref<80x128xf32, #tpu.memory_space<vmem>>, vector<1x128xf32>,
    %c79 = arith.constant 79 : index
    %c0_5 = arith.constant 0 : index
    %5 = vector.load %arg18[%c79, %c0_5] : memref<80x128xf32, #tpu.memory_space<vmem>>, vector<1x128xf32>
    tpu.vector_store %arg18[%c79, %c0_5], %3 {strides = array<i32>} : memref<80x128xf32, #tpu.memory_space<vmem>>, vector<1x128xf32>,
    %c0_6 = arith.constant 0 : index
    %c0_7 = arith.constant 0 : index
    %6 = vector.load %arg3[%c0_6, %c0_7] : memref<1x128xf32, #tpu.memory_space<vmem>>, vector<1x128xf32>
    %7 = vector.shape_cast %6 : vector<1x128xf32> to vector<1x128xf32>
    %8 = vector.broadcast %7 : vector<1x128xf32> to vector<142x128xf32>
    %c0_8 = arith.constant 0 : index
    %c0_9 = arith.constant 0 : index
    %9 = vector.load %arg1[%c0_8, %c0_9] : memref<144x64xf32, #tpu.memory_space<vmem>>, vector<142x64xf32>
    %c0_10 = arith.constant 0 : index
    %c0_11 = arith.constant 0 : index
    %c0_12 = arith.constant 0 : index
    %10 = vector.load %arg2[%c0_10, %c0_11, %c0_12] : memref<3x64x128xf32, #tpu.memory_space<vmem>>, vector<1x64x128xf32>
    %11 = vector.shape_cast %10 : vector<1x64x128xf32> to vector<64x128xf32>
    %cst_13 = arith.constant dense<0.000000e+00> : vector<142x128xf32>
    %12 = tpu.matmul %9, %11, %cst_13 {dimension_numbers = #tpu.dot_dimension_numbers<[1], [0], [0], [1], [0, 0, 1, 1], [], []>} : vector<142x64xf32>, vector<64x128xf32>, vector<142x128xf32> -> vector<142x128xf32>
    %13 = arith.addf %8, %12 : vector<142x128xf32>
    %c1 = arith.constant 1 : index
    %c0_14 = arith.constant 0 : index
    %14 = vector.load %arg1[%c1, %c0_14] : memref<144x64xf32, #tpu.memory_space<vmem>>, vector<142x64xf32>
    %c1_15 = arith.constant 1 : index
    %c0_16 = arith.constant 0 : index
    %c0_17 = arith.constant 0 : index
    %15 = vector.load %arg2[%c1_15, %c0_16, %c0_17] : memref<3x64x128xf32, #tpu.memory_space<vmem>>, vector<1x64x128xf32>
    %16 = vector.shape_cast %15 : vector<1x64x128xf32> to vector<64x128xf32>
    %cst_18 = arith.constant dense<0.000000e+00> : vector<142x128xf32>
    %17 = tpu.matmul %14, %16, %cst_18 {dimension_numbers = #tpu.dot_dimension_numbers<[1], [0], [0], [1], [0, 0, 1, 1], [], []>} : vector<142x64xf32>, vector<64x128xf32>, vector<142x128xf32> -> vector<142x128xf32>
    %18 = arith.addf %13, %17 : vector<142x128xf32>
    %c2 = arith.constant 2 : index
    %c0_19 = arith.constant 0 : index
    %19 = vector.load %arg1[%c2, %c0_19] : memref<144x64xf32, #tpu.memory_space<vmem>>, vector<142x64xf32>
    %c2_20 = arith.constant 2 : index
    %c0_21 = arith.constant 0 : index
    %c0_22 = arith.constant 0 : index
    %20 = vector.load %arg2[%c2_20, %c0_21, %c0_22] : memref<3x64x128xf32, #tpu.memory_space<vmem>>, vector<1x64x128xf32>
    %21 = vector.shape_cast %20 : vector<1x64x128xf32> to vector<64x128xf32>
    %cst_23 = arith.constant dense<0.000000e+00> : vector<142x128xf32>
    %22 = tpu.matmul %19, %21, %cst_23 {dimension_numbers = #tpu.dot_dimension_numbers<[1], [0], [0], [1], [0, 0, 1, 1], [], []>} : vector<142x64xf32>, vector<64x128xf32>, vector<142x128xf32> -> vector<142x128xf32>
    %23 = arith.addf %18, %22 : vector<142x128xf32>
    %cst_24 = arith.constant 0.000000e+00 : f32
    %24 = vector.broadcast %cst_24 : f32 to vector<142x128xf32>
    %25 = arith.maximumf %23, %24 : vector<142x128xf32>
    %c0_25 = arith.constant 0 : index
    %c0_26 = arith.constant 0 : index
    %26 = vector.load %arg4[%c0_25, %c0_26] : memref<142x1xf32, #tpu.memory_space<vmem>>, vector<142x1xf32>
    %27 = vector.broadcast %26 : vector<142x1xf32> to vector<142x128xf32>
    %28 = arith.mulf %25, %27 : vector<142x128xf32>
    %c1_27 = arith.constant 1 : index
    %c0_28 = arith.constant 0 : index
    %29 = vector.load %arg16[%c1_27, %c0_28] : memref<144x128xf32, #tpu.memory_space<vmem>>, vector<142x128xf32>
    tpu.vector_store %arg16[%c1_27, %c0_28], %28 {strides = array<i32>} : memref<144x128xf32, #tpu.memory_space<vmem>>, vector<142x128xf32>,
    %c0_29 = arith.constant 0 : index
    %c0_30 = arith.constant 0 : index
    %30 = vector.load %arg6[%c0_29, %c0_30] : memref<1x128xf32, #tpu.memory_space<vmem>>, vector<1x128xf32>
    %31 = vector.shape_cast %30 : vector<1x128xf32> to vector<1x128xf32>
    %32 = vector.broadcast %31 : vector<1x128xf32> to vector<142x128xf32>
    %c0_31 = arith.constant 0 : index
    %c0_32 = arith.constant 0 : index
    %33 = vector.load %arg16[%c0_31, %c0_32] : memref<144x128xf32, #tpu.memory_space<vmem>>, vector<142x128xf32>
    %c0_33 = arith.constant 0 : index
    %c0_34 = arith.constant 0 : index
    %c0_35 = arith.constant 0 : index
    %34 = vector.load %arg5[%c0_33, %c0_34, %c0_35] : memref<3x128x128xf32, #tpu.memory_space<vmem>>, vector<1x128x128xf32>
    %35 = vector.shape_cast %34 : vector<1x128x128xf32> to vector<128x128xf32>
    %cst_36 = arith.constant dense<0.000000e+00> : vector<142x128xf32>
    %36 = tpu.matmul %33, %35, %cst_36 {dimension_numbers = #tpu.dot_dimension_numbers<[1], [0], [0], [1], [0, 0, 1, 1], [], []>} : vector<142x128xf32>, vector<128x128xf32>, vector<142x128xf32> -> vector<142x128xf32>
    %37 = arith.addf %32, %36 : vector<142x128xf32>
    %c1_37 = arith.constant 1 : index
    %c0_38 = arith.constant 0 : index
    %38 = vector.load %arg16[%c1_37, %c0_38] : memref<144x128xf32, #tpu.memory_space<vmem>>, vector<142x128xf32>
    %c1_39 = arith.constant 1 : index
    %c0_40 = arith.constant 0 : index
    %c0_41 = arith.constant 0 : index
    %39 = vector.load %arg5[%c1_39, %c0_40, %c0_41] : memref<3x128x128xf32, #tpu.memory_space<vmem>>, vector<1x128x128xf32>
    %40 = vector.shape_cast %39 : vector<1x128x128xf32> to vector<128x128xf32>
    %cst_42 = arith.constant dense<0.000000e+00> : vector<142x128xf32>
    %41 = tpu.matmul %38, %40, %cst_42 {dimension_numbers = #tpu.dot_dimension_numbers<[1], [0], [0], [1], [0, 0, 1, 1], [], []>} : vector<142x128xf32>, vector<128x128xf32>, vector<142x128xf32> -> vector<142x128xf32>
    %42 = arith.addf %37, %41 : vector<142x128xf32>
    %c2_43 = arith.constant 2 : index
    %c0_44 = arith.constant 0 : index
    %43 = vector.load %arg16[%c2_43, %c0_44] : memref<144x128xf32, #tpu.memory_space<vmem>>, vector<142x128xf32>
    %c2_45 = arith.constant 2 : index
    %c0_46 = arith.constant 0 : index
    %c0_47 = arith.constant 0 : index
    %44 = vector.load %arg5[%c2_45, %c0_46, %c0_47] : memref<3x128x128xf32, #tpu.memory_space<vmem>>, vector<1x128x128xf32>
    %45 = vector.shape_cast %44 : vector<1x128x128xf32> to vector<128x128xf32>
    %cst_48 = arith.constant dense<0.000000e+00> : vector<142x128xf32>
    %46 = tpu.matmul %43, %45, %cst_48 {dimension_numbers = #tpu.dot_dimension_numbers<[1], [0], [0], [1], [0, 0, 1, 1], [], []>} : vector<142x128xf32>, vector<128x128xf32>, vector<142x128xf32> -> vector<142x128xf32>
    %47 = arith.addf %42, %46 : vector<142x128xf32>
    %cst_49 = arith.constant 0.000000e+00 : f32
    %48 = vector.broadcast %cst_49 : f32 to vector<142x128xf32>
    %49 = arith.maximumf %47, %48 : vector<142x128xf32>
    %c0_50 = arith.constant 0 : index
    %c0_51 = arith.constant 0 : index
    %50 = vector.load %arg7[%c0_50, %c0_51] : memref<80x142xf32, #tpu.memory_space<vmem>>, vector<80x142xf32>
    %cst_52 = arith.constant dense<0.000000e+00> : vector<80x128xf32>
    %51 = tpu.matmul %50, %49, %cst_52 {dimension_numbers = #tpu.dot_dimension_numbers<[1], [0], [0], [1], [0, 0, 1, 1], [], []>} : vector<80x142xf32>, vector<142x128xf32>, vector<80x128xf32> -> vector<80x128xf32>
    %c0_53 = arith.constant 0 : index
    %c0_54 = arith.constant 0 : index
    %52 = vector.load %arg8[%c0_53, %c0_54] : memref<128x64xf32, #tpu.memory_space<vmem>>, vector<128x64xf32>
    %cst_55 = arith.constant dense<0.000000e+00> : vector<80x64xf32>
    %53 = tpu.matmul %51, %52, %cst_55 {dimension_numbers = #tpu.dot_dimension_numbers<[1], [0], [0], [1], [0, 0, 1, 1], [], []>} : vector<80x128xf32>, vector<128x64xf32>, vector<80x64xf32> -> vector<80x64xf32>
    %c0_56 = arith.constant 0 : index
    %c0_57 = arith.constant 0 : index
    %54 = vector.load %arg17[%c0_56, %c0_57] : memref<80x64xf32, #tpu.memory_space<vmem>>, vector<80x64xf32>
    tpu.vector_store %arg17[%c0_56, %c0_57], %53 {strides = array<i32>} : memref<80x64xf32, #tpu.memory_space<vmem>>, vector<80x64xf32>,
    %c0_58 = arith.constant 0 : index
    %c0_59 = arith.constant 0 : index
    %55 = vector.load %arg10[%c0_58, %c0_59] : memref<1x128xf32, #tpu.memory_space<vmem>>, vector<1x128xf32>
    %56 = vector.shape_cast %55 : vector<1x128xf32> to vector<1x128xf32>
    %57 = vector.broadcast %56 : vector<1x128xf32> to vector<78x128xf32>
    %c0_60 = arith.constant 0 : index
    %c0_61 = arith.constant 0 : index
    %58 = vector.load %arg17[%c0_60, %c0_61] : memref<80x64xf32, #tpu.memory_space<vmem>>, vector<78x64xf32>
    %c0_62 = arith.constant 0 : index
    %c0_63 = arith.constant 0 : index
    %c0_64 = arith.constant 0 : index
    %59 = vector.load %arg9[%c0_62, %c0_63, %c0_64] : memref<3x64x128xf32, #tpu.memory_space<vmem>>, vector<1x64x128xf32>
    %60 = vector.shape_cast %59 : vector<1x64x128xf32> to vector<64x128xf32>
    %cst_65 = arith.constant dense<0.000000e+00> : vector<78x128xf32>
    %61 = tpu.matmul %58, %60, %cst_65 {dimension_numbers = #tpu.dot_dimension_numbers<[1], [0], [0], [1], [0, 0, 1, 1], [], []>} : vector<78x64xf32>, vector<64x128xf32>, vector<78x128xf32> -> vector<78x128xf32>
    %62 = arith.addf %57, %61 : vector<78x128xf32>
    %c1_66 = arith.constant 1 : index
    %c0_67 = arith.constant 0 : index
    %63 = vector.load %arg17[%c1_66, %c0_67] : memref<80x64xf32, #tpu.memory_space<vmem>>, vector<78x64xf32>
    %c1_68 = arith.constant 1 : index
    %c0_69 = arith.constant 0 : index
    %c0_70 = arith.constant 0 : index
    %64 = vector.load %arg9[%c1_68, %c0_69, %c0_70] : memref<3x64x128xf32, #tpu.memory_space<vmem>>, vector<1x64x128xf32>
    %65 = vector.shape_cast %64 : vector<1x64x128xf32> to vector<64x128xf32>
    %cst_71 = arith.constant dense<0.000000e+00> : vector<78x128xf32>
    %66 = tpu.matmul %63, %65, %cst_71 {dimension_numbers = #tpu.dot_dimension_numbers<[1], [0], [0], [1], [0, 0, 1, 1], [], []>} : vector<78x64xf32>, vector<64x128xf32>, vector<78x128xf32> -> vector<78x128xf32>
    %67 = arith.addf %62, %66 : vector<78x128xf32>
    %c2_72 = arith.constant 2 : index
    %c0_73 = arith.constant 0 : index
    %68 = vector.load %arg17[%c2_72, %c0_73] : memref<80x64xf32, #tpu.memory_space<vmem>>, vector<78x64xf32>
    %c2_74 = arith.constant 2 : index
    %c0_75 = arith.constant 0 : index
    %c0_76 = arith.constant 0 : index
    %69 = vector.load %arg9[%c2_74, %c0_75, %c0_76] : memref<3x64x128xf32, #tpu.memory_space<vmem>>, vector<1x64x128xf32>
    %70 = vector.shape_cast %69 : vector<1x64x128xf32> to vector<64x128xf32>
    %cst_77 = arith.constant dense<0.000000e+00> : vector<78x128xf32>
    %71 = tpu.matmul %68, %70, %cst_77 {dimension_numbers = #tpu.dot_dimension_numbers<[1], [0], [0], [1], [0, 0, 1, 1], [], []>} : vector<78x64xf32>, vector<64x128xf32>, vector<78x128xf32> -> vector<78x128xf32>
    %72 = arith.addf %67, %71 : vector<78x128xf32>
    %cst_78 = arith.constant 0.000000e+00 : f32
    %73 = vector.broadcast %cst_78 : f32 to vector<78x128xf32>
    %74 = arith.maximumf %72, %73 : vector<78x128xf32>
    %c0_79 = arith.constant 0 : index
    %c0_80 = arith.constant 0 : index
    %75 = vector.load %arg11[%c0_79, %c0_80] : memref<78x1xf32, #tpu.memory_space<vmem>>, vector<78x1xf32>
    %76 = vector.broadcast %75 : vector<78x1xf32> to vector<78x128xf32>
    %77 = arith.mulf %74, %76 : vector<78x128xf32>
    %c1_81 = arith.constant 1 : index
    %c0_82 = arith.constant 0 : index
    %78 = vector.load %arg18[%c1_81, %c0_82] : memref<80x128xf32, #tpu.memory_space<vmem>>, vector<78x128xf32>
    tpu.vector_store %arg18[%c1_81, %c0_82], %77 {strides = array<i32>} : memref<80x128xf32, #tpu.memory_space<vmem>>, vector<78x128xf32>,
    %c0_83 = arith.constant 0 : index
    %c0_84 = arith.constant 0 : index
    %79 = vector.load %arg13[%c0_83, %c0_84] : memref<1x128xf32, #tpu.memory_space<vmem>>, vector<1x128xf32>
    %80 = vector.shape_cast %79 : vector<1x128xf32> to vector<1x128xf32>
    %81 = vector.broadcast %80 : vector<1x128xf32> to vector<78x128xf32>
    %c0_85 = arith.constant 0 : index
    %c0_86 = arith.constant 0 : index
    %82 = vector.load %arg18[%c0_85, %c0_86] : memref<80x128xf32, #tpu.memory_space<vmem>>, vector<78x128xf32>
    %c0_87 = arith.constant 0 : index
    %c0_88 = arith.constant 0 : index
    %c0_89 = arith.constant 0 : index
    %83 = vector.load %arg12[%c0_87, %c0_88, %c0_89] : memref<3x128x128xf32, #tpu.memory_space<vmem>>, vector<1x128x128xf32>
    %84 = vector.shape_cast %83 : vector<1x128x128xf32> to vector<128x128xf32>
    %cst_90 = arith.constant dense<0.000000e+00> : vector<78x128xf32>
    %85 = tpu.matmul %82, %84, %cst_90 {dimension_numbers = #tpu.dot_dimension_numbers<[1], [0], [0], [1], [0, 0, 1, 1], [], []>} : vector<78x128xf32>, vector<128x128xf32>, vector<78x128xf32> -> vector<78x128xf32>
    %86 = arith.addf %81, %85 : vector<78x128xf32>
    %c1_91 = arith.constant 1 : index
    %c0_92 = arith.constant 0 : index
    %87 = vector.load %arg18[%c1_91, %c0_92] : memref<80x128xf32, #tpu.memory_space<vmem>>, vector<78x128xf32>
    %c1_93 = arith.constant 1 : index
    %c0_94 = arith.constant 0 : index
    %c0_95 = arith.constant 0 : index
    %88 = vector.load %arg12[%c1_93, %c0_94, %c0_95] : memref<3x128x128xf32, #tpu.memory_space<vmem>>, vector<1x128x128xf32>
    %89 = vector.shape_cast %88 : vector<1x128x128xf32> to vector<128x128xf32>
    %cst_96 = arith.constant dense<0.000000e+00> : vector<78x128xf32>
    %90 = tpu.matmul %87, %89, %cst_96 {dimension_numbers = #tpu.dot_dimension_numbers<[1], [0], [0], [1], [0, 0, 1, 1], [], []>} : vector<78x128xf32>, vector<128x128xf32>, vector<78x128xf32> -> vector<78x128xf32>
    %91 = arith.addf %86, %90 : vector<78x128xf32>
    %c2_97 = arith.constant 2 : index
    %c0_98 = arith.constant 0 : index
    %92 = vector.load %arg18[%c2_97, %c0_98] : memref<80x128xf32, #tpu.memory_space<vmem>>, vector<78x128xf32>
    %c2_99 = arith.constant 2 : index
    %c0_100 = arith.constant 0 : index
    %c0_101 = arith.constant 0 : index
    %93 = vector.load %arg12[%c2_99, %c0_100, %c0_101] : memref<3x128x128xf32, #tpu.memory_space<vmem>>, vector<1x128x128xf32>
    %94 = vector.shape_cast %93 : vector<1x128x128xf32> to vector<128x128xf32>
    %cst_102 = arith.constant dense<0.000000e+00> : vector<78x128xf32>
    %95 = tpu.matmul %92, %94, %cst_102 {dimension_numbers = #tpu.dot_dimension_numbers<[1], [0], [0], [1], [0, 0, 1, 1], [], []>} : vector<78x128xf32>, vector<128x128xf32>, vector<78x128xf32> -> vector<78x128xf32>
    %96 = arith.addf %91, %95 : vector<78x128xf32>
    %cst_103 = arith.constant 0.000000e+00 : f32
    %97 = vector.broadcast %cst_103 : f32 to vector<78x128xf32>
    %98 = arith.maximumf %96, %97 : vector<78x128xf32>
    %c0_104 = arith.constant 0 : index
    %c0_105 = arith.constant 0 : index
    %99 = vector.load %arg14[%c0_104, %c0_105] : memref<64x78xf32, #tpu.memory_space<vmem>>, vector<64x78xf32>
    %cst_106 = arith.constant dense<0.000000e+00> : vector<64x128xf32>
    %100 = tpu.matmul %99, %98, %cst_106 {dimension_numbers = #tpu.dot_dimension_numbers<[1], [0], [0], [1], [0, 0, 1, 1], [], []>} : vector<64x78xf32>, vector<78x128xf32>, vector<64x128xf32> -> vector<64x128xf32>
    %c0_107 = arith.constant 0 : index
    %c0_108 = arith.constant 0 : index
    %101 = vector.load %arg15[%c0_107, %c0_108] : memref<64x128xf32, #tpu.memory_space<vmem>>, vector<64x128xf32>
    tpu.vector_store %arg15[%c0_107, %c0_108], %100 {strides = array<i32>} : memref<64x128xf32, #tpu.memory_space<vmem>>, vector<64x128xf32>,
    return
  }
  func.func @transform_0(%arg0: i32) -> (i32, i32) {
    %c0_i32 = arith.constant 0 : i32
    %c0_i32_0 = arith.constant 0 : i32
    return %arg0, %c0_i32 : i32, i32
  }
  func.func @transform_1(%arg0: i32) -> (i32, i32, i32) {
    %c0_i32 = arith.constant 0 : i32
    %c0_i32_0 = arith.constant 0 : i32
    %c0_i32_1 = arith.constant 0 : i32
    %c0_i32_2 = arith.constant 0 : i32
    return %c0_i32, %c0_i32_0, %c0_i32_1 : i32, i32, i32
  }
  func.func @transform_2(%arg0: i32) -> (i32, i32) {
    %c0_i32 = arith.constant 0 : i32
    %c0_i32_0 = arith.constant 0 : i32
    %c0_i32_1 = arith.constant 0 : i32
    return %c0_i32, %c0_i32_0 : i32, i32
  }
  func.func @transform_3(%arg0: i32) -> (i32, i32) {
    %c0_i32 = arith.constant 0 : i32
    %c0_i32_0 = arith.constant 0 : i32
    %c0_i32_1 = arith.constant 0 : i32
    return %c0_i32, %c0_i32_0 : i32, i32
  }
  func.func @transform_4(%arg0: i32) -> (i32, i32, i32) {
    %c0_i32 = arith.constant 0 : i32
    %c0_i32_0 = arith.constant 0 : i32
    %c0_i32_1 = arith.constant 0 : i32
    %c0_i32_2 = arith.constant 0 : i32
    return %c0_i32, %c0_i32_0, %c0_i32_1 : i32, i32, i32
  }
  func.func @transform_5(%arg0: i32) -> (i32, i32) {
    %c0_i32 = arith.constant 0 : i32
    %c0_i32_0 = arith.constant 0 : i32
    %c0_i32_1 = arith.constant 0 : i32
    return %c0_i32, %c0_i32_0 : i32, i32
  }
  func.func @transform_6(%arg0: i32) -> (i32, i32) {
    %c0_i32 = arith.constant 0 : i32
    %c0_i32_0 = arith.constant 0 : i32
    %c0_i32_1 = arith.constant 0 : i32
    return %c0_i32, %c0_i32_0 : i32, i32
  }
  func.func @transform_7(%arg0: i32) -> (i32, i32) {
    %c0_i32 = arith.constant 0 : i32
    %c0_i32_0 = arith.constant 0 : i32
    %c0_i32_1 = arith.constant 0 : i32
    return %c0_i32, %c0_i32_0 : i32, i32
  }
  func.func @transform_8(%arg0: i32) -> (i32, i32, i32) {
    %c0_i32 = arith.constant 0 : i32
    %c0_i32_0 = arith.constant 0 : i32
    %c0_i32_1 = arith.constant 0 : i32
    %c0_i32_2 = arith.constant 0 : i32
    return %c0_i32, %c0_i32_0, %c0_i32_1 : i32, i32, i32
  }
  func.func @transform_9(%arg0: i32) -> (i32, i32) {
    %c0_i32 = arith.constant 0 : i32
    %c0_i32_0 = arith.constant 0 : i32
    %c0_i32_1 = arith.constant 0 : i32
    return %c0_i32, %c0_i32_0 : i32, i32
  }
  func.func @transform_10(%arg0: i32) -> (i32, i32) {
    %c0_i32 = arith.constant 0 : i32
    %c0_i32_0 = arith.constant 0 : i32
    %c0_i32_1 = arith.constant 0 : i32
    return %c0_i32, %c0_i32_0 : i32, i32
  }
  func.func @transform_11(%arg0: i32) -> (i32, i32, i32) {
    %c0_i32 = arith.constant 0 : i32
    %c0_i32_0 = arith.constant 0 : i32
    %c0_i32_1 = arith.constant 0 : i32
    %c0_i32_2 = arith.constant 0 : i32
    return %c0_i32, %c0_i32_0, %c0_i32_1 : i32, i32, i32
  }
  func.func @transform_12(%arg0: i32) -> (i32, i32) {
    %c0_i32 = arith.constant 0 : i32
    %c0_i32_0 = arith.constant 0 : i32
    %c0_i32_1 = arith.constant 0 : i32
    return %c0_i32, %c0_i32_0 : i32, i32
  }
  func.func @transform_13(%arg0: i32) -> (i32, i32) {
    %c0_i32 = arith.constant 0 : i32
    %c0_i32_0 = arith.constant 0 : i32
    %c0_i32_1 = arith.constant 0 : i32
    return %c0_i32, %c0_i32_0 : i32, i32
  }
  func.func @transform_14(%arg0: i32) -> (i32, i32) {
    %c0_i32 = arith.constant 0 : i32
    %c0_i32_0 = arith.constant 0 : i32
    return %arg0, %c0_i32 : i32, i32
  }
}

</mosaic_0001>

<bundles_post_ra>
// kernel: forward.1
= control target key start
LH: loop header
LB: loop body
LE: loop exit
PB: predicated region body
PF: predicated region fallthrough
CT: control target
= control target key end

     0   :  { %s4946_s29 = smov 0   ;;  %s6015_s0 = inlined_call_operand.vmem [shape: f32[288,64], index: 0, kind: input, shape index: {}]   ;;  %s6016_s1 = inlined_call_operand.vmem [shape: f32[3,64,128], index: 1, kind: input, shape index: {}]   ;;  %s6017_s2 = inlined_call_operand.vmem [shape: f32[1,128], index: 2, kind: input, shape index: {}]   ;;  %s6018_s3 = inlined_call_operand.vmem [shape: f32[142,1], index: 3, kind: input, shape index: {}]   ;;  %s6019_s4 = inlined_call_operand.vmem [shape: f32[3,128,128], index: 4, kind: input, shape index: {}]   ;;  %s6020_s5 = inlined_call_operand.vmem [shape: f32[1,128], index: 5, kind: input, shape index: {}]   ;;  %s6021_s6 = inlined_call_operand.vmem [shape: f32[80,142], index: 6, kind: input, shape index: {}]   ;;  %s6022_s7 = inlined_call_operand.vmem [shape: f32[128,64], index: 7, kind: input, shape index: {}]   ;;  %s6023_s8 = inlined_call_operand.vmem [shape: f32[3,64,128], index: 8, kind: input, shape index: {}]   ;;  %s6024_s9 = inlined_call_operand.vmem [shape: f32[1,128], index: 9, kind: input, shape index: {}]   ;;  %s6025_s10 = inlined_call_operand.vmem [shape: f32[78,1], index: 10, kind: input, shape index: {}]   ;;  %s6026_s11 = inlined_call_operand.vmem [shape: f32[3,128,128], index: 11, kind: input, shape index: {}]   ;;  %s6027_s12 = inlined_call_operand.vmem [shape: f32[1,128], index: 12, kind: input, shape index: {}]   ;;  %s6028_s13 = inlined_call_operand.vmem [shape: f32[64,78], index: 13, kind: input, shape index: {}]   ;;  %s6029_s14 = inlined_call_operand.vmem [shape: f32[128,128], index: 14, kind: output, shape index: {}]  }
   0x1 LB: > { %s3660_s30 = sadd.s32 4294967295, %s4867_s29   ;;  %p3664_p0 = scmp.ge.s32.totalorder %s4867_s29, 1  ;;  %s4867_s29 = sphi %s4946_s29, %s24_s29  }
   0x2   : > { %p413_p1 = scmp.lt.s32.totalorder %s4867_s29, 3 }
   0x4   : > { %p414_p2 = pnand %p3664_p0, %p413_p1 }
   0x5   : > { %s459_s21 = smul.u32 (!%p414_p2), 18, %s3660_s30 }
   0x6   : > { %417 = sbr.rel (%p414_p2) target bundleno = 1691 (0x69b), region = 76 }
   0x7   : > { %p460_p3 = scmp.lt.s32.totalorder (!%p414_p2), %s459_s21, 35 }
   0xb   : > { %v507_v0 = vld [vmem:[%s6016_s1 + $0x38] sm:$0xff]  ;;  %v506_v1 = vld [vmem:[%s6016_s1 + $0x30] sm:$0xff]  ;;  %v505_v4 = vld [vmem:[%s6016_s1 + $0x28] sm:$0xff]  ;;  %s6031_s21 = smov (!%p460_p3, %s459_s21), 35  ;;  %vm508_vm0 = vcmask 523264   ;;  %v4869_v49 = vmov 0  }
   0xc   : > { %v3694_v2 = vld [vmem:[%s6016_s1 + $0x78] sm:$0xff]  ;;  %4230 = vmatprep.subr.mxu0 %v507_v0  ;;  %v3693_v3 = vld [vmem:[%s6016_s1 + $0x70] sm:$0xff]  ;;  %v3692_v5 = vld [vmem:[%s6016_s1 + $0x68] sm:$0xff]  ;;  %s3665_s23 = sshll.u32 %s6031_s21, 3  ;;  %4859 = vset.pattern.permute.xlu0 %v4869_v49  ;;  %vm2074_vm1 = vcmask 113664   ;;  %vm2105_vm2 = vcmask 1045504  }
   0xd   : > { %4273 = vmatprep.subr.mxu1 %v3694_v2  ;;  %4231 = vmatpush3.msra.mxu0 %v507_v0  ;;  %v504_v6 = vld [vmem:[%s6016_s1 + $0x20] sm:$0xff]  ;;  %v503_v8 = vld [vmem:[%s6016_s1 + $0x18] sm:$0xff]  ;;  %v502_v10 = vld [vmem:[%s6016_s1 + $0x10] sm:$0xff]  ;;  %s4995_s16 = scalar_lea.vmem %s6015_s0, %s3665_s23  ;;  %vm3463_vm3 = vcmask 637952  }
   0xe   : > { %4274 = vmatpush3.msra.mxu1 %v3694_v2  ;;  %4232 = vmatprep.subr.mxu0 %v506_v1  ;;  %v3691_v7 = vld [vmem:[%s6016_s1 + $0x60] sm:$0xff]  ;;  %v3690_v9 = vld [vmem:[%s6016_s1 + $0x58] sm:$0xff]  ;;  %v3689_v11 = vld [vmem:[%s6016_s1 + $0x50] sm:$0xff] }
   0xf   : > { %4275 = vmatprep.subr.mxu1 %v3693_v3  ;;  %4233 = vmatpush3.msra.mxu0 %v506_v1  ;;  %v501_v12 = vld [vmem:[%s6016_s1 + $0x8] sm:$0xff]  ;;  %v482_v14 = vld [vmem:[%s4995_s16] sm:$0xff]  ;;  %v3720_v18 = vld [vmem:[%s6016_s1 + $0xb8] sm:$0xff] }
  0x10   : > { %4276 = vmatpush3.msra.mxu1 %v3693_v3  ;;  %4234 = vmatprep.subr.mxu0 %v505_v4  ;;  %v3688_v13 = vld [vmem:[%s6016_s1 + $0x48] sm:$0xff]  ;;  %v500_v15 = vld [vmem:[%s6016_s1] sm:$0xff]  ;;  %v484_v21 = vld [vmem:[%s4995_s16 + $0x10] sm:$0xff] }
  0x11   : > { %4277 = vmatprep.subr.mxu1 %v3692_v5  ;;  %4235 = vmatpush3.msra.mxu0 %v505_v4  ;;  %v3687_v16 = vld [vmem:[%s6016_s1 + $0x40] sm:$0xff]  ;;  %v483_v17 = vld [vmem:[%s4995_s16 + $0x8] sm:$0xff]  ;;  %v738_v22 = vld [vmem:[%s4995_s16 + $0x11] sm:$0xff] }
  0x12   : > { %4278 = vmatpush3.msra.mxu1 %v3692_v5  ;;  %4236 = vmatprep.subr.mxu0 %v504_v6  ;;  %v736_v19 = vld [vmem:[%s4995_s16 + $0x1] sm:$0xff]  ;;  %v737_v20 = vld [vmem:[%s4995_s16 + $0x9] sm:$0xff]  ;;  %v485_v23 = vld [vmem:[%s4995_s16 + $0x18] sm:$0xff] }
  0x13   : > { %4279 = vmatprep.subr.mxu1 %v3691_v7  ;;  %4237 = vmatpush3.msra.mxu0 %v504_v6  ;;  %v3719_v24 = vld [vmem:[%s6016_s1 + $0xb0] sm:$0xff]  ;;  %v486_v25 = vld [vmem:[%s4995_s16 + $0x20] sm:$0xff]  ;;  %v3718_v27 = vld [vmem:[%s6016_s1 + $0xa8] sm:$0xff] }
  0x14   : > { %4280 = vmatpush3.msra.mxu1 %v3691_v7  ;;  %4238 = vmatprep.subr.mxu0 %v503_v8  ;;  %v739_v26 = vld [vmem:[%s4995_s16 + $0x19] sm:$0xff]  ;;  %v740_v28 = vld [vmem:[%s4995_s16 + $0x21] sm:$0xff]  ;;  %v488_v31 = vld [vmem:[%s4995_s16 + $0x30] sm:$0xff] }
  0x15   : > { %4281 = vmatprep.subr.mxu1 %v3690_v9  ;;  %4239 = vmatpush3.msra.mxu0 %v503_v8  ;;  %v487_v29 = vld [vmem:[%s4995_s16 + $0x28] sm:$0xff]  ;;  %v3717_v30 = vld [vmem:[%s6016_s1 + $0xa0] sm:$0xff]  ;;  %v3716_v33 = vld [vmem:[%s6016_s1 + $0x98] sm:$0xff] }
  0x16   : > { %4282 = vmatpush3.msra.mxu1 %v3690_v9  ;;  %4240 = vmatprep.subr.mxu0 %v502_v10  ;;  %v741_v32 = vld [vmem:[%s4995_s16 + $0x29] sm:$0xff]  ;;  %v742_v34 = vld [vmem:[%s4995_s16 + $0x31] sm:$0xff]  ;;  %v490_v37 = vld [vmem:[%s4995_s16 + $0x40] sm:$0xff] }
  0x17   : > { %4283 = vmatprep.subr.mxu1 %v3689_v11  ;;  %4241 = vmatpush3.msra.mxu0 %v502_v10  ;;  %v489_v35 = vld [vmem:[%s4995_s16 + $0x38] sm:$0xff]  ;;  %v3715_v36 = vld [vmem:[%s6016_s1 + $0x90] sm:$0xff]  ;;  %v3714_v39 = vld [vmem:[%s6016_s1 + $0x88] sm:$0xff] }
  0x18   : > { %4284 = vmatpush3.msra.mxu1 %v3689_v11  ;;  %4242 = vmatprep.subr.mxu0 %v501_v12  ;;  %v743_v38 = vld [vmem:[%s4995_s16 + $0x39] sm:$0xff]  ;;  %v744_v40 = vld [vmem:[%s4995_s16 + $0x41] sm:$0xff]  ;;  %v492_v43 = vld [vmem:[%s4995_s16 + $0x50] sm:$0xff] }
  0x19   : > { %4285 = vmatprep.subr.mxu1 %v3688_v13  ;;  %4243 = vmatpush3.msra.mxu0 %v501_v12  ;;  %v491_v41 = vld [vmem:[%s4995_s16 + $0x48] sm:$0xff]  ;;  %v3713_v42 = vld [vmem:[%s6016_s1 + $0x80] sm:$0xff]  ;;  %v746_v45 = vld [vmem:[%s4995_s16 + $0x51] sm:$0xff] }
  0x1a   : > { %4246 = vmatprep.mubr.msk.f32.mxu0 %vm508_vm0, %v482_v14  ;;  %4244 = vmatprep.subr.mxu0 %v500_v15  ;;  %v745_v44 = vld [vmem:[%s4995_s16 + $0x49] sm:$0xff]  ;;  %v1262_v46 = vld [vmem:[%s6018_s3] sm:$0xff]  ;;  %v493_v47 = vld [vmem:[%s4995_s16 + $0x58] sm:$0xff] }
  0x1b   : > { %4286 = vmatpush3.msra.mxu1 %v3688_v13  ;;  %4245 = vmatpush3.msra.mxu0 %v500_v15  ;;  %v494_v48 = vld [vmem:[%s4995_s16 + $0x60] sm:$0xff]  ;;  %v1264_v50 = vld [vmem:[%s6018_s3 + $0x10] sm:$0xff]  ;;  %v1263_v53 = vld [vmem:[%s6018_s3 + $0x8] sm:$0xff] }
  0x1c   : > { %4287 = vmatprep.subr.mxu1 %v3687_v16  ;;  %4247 = vmatmul.mubr.msk.f32.vlgmr.msra.gmra.mxu0 %vm508_vm0, %v483_v17  ;;  %v747_v51 = vld [vmem:[%s4995_s16 + $0x59] sm:$0xff]  ;;  %v748_v52 = vld [vmem:[%s4995_s16 + $0x61] sm:$0xff]  ;;  %v496_v55 = vld [vmem:[%s4995_s16 + $0x70] sm:$0xff] }
  0x1d   : > { %4316 = vmatprep.subr.mxu0 %v3720_v18  ;;  %4288 = vmatpush3.msra.mxu1 %v3687_v16  ;;  %v495_v54 = vld [vmem:[%s4995_s16 + $0x68] sm:$0xff]  ;;  %v1265_v56 = vld [vmem:[%s6018_s3 + $0x18] sm:$0xff]  ;;  %v1266_v59 = vld [vmem:[%s6018_s3 + $0x20] sm:$0xff] }
  0x1e   : > { %4289 = vmatprep.mubr.msk.f32.mxu1 %vm508_vm0, %v736_v19  ;;  %4317 = vmatpush3.msra.mxu0 %v3720_v18  ;;  %v749_v57 = vld [vmem:[%s4995_s16 + $0x69] sm:$0xff]  ;;  %v750_v58 = vld [vmem:[%s4995_s16 + $0x71] sm:$0xff]  ;;  %v498_v61 = vld [vmem:[%s4995_s16 + $0x80] sm:$0xff] }
  0x1f   : > { %4290 = vmatmul.mubr.msk.f32.vlgmr.msra.gmra.mxu1 %vm508_vm0, %v737_v20  ;;  %4249 = vmatprep.mubr.msk.f32.mxu0 %vm508_vm0, %v484_v21  ;;  %v497_v60 = vld [vmem:[%s4995_s16 + $0x78] sm:$0xff]  ;;  %v1267_v62 = vld [vmem:[%s6018_s3 + $0x28] sm:$0xff]  ;;  %v1268_v1 = vld [vmem:[%s6018_s3 + $0x30] sm:$0xff] }
  0x20   : > { %4292 = vmatprep.mubr.msk.f32.mxu1 %vm508_vm0, %v738_v22  ;;  %4250 = vmatmul.mubr.msk.f32.gmra.mxu0 %vm508_vm0, %v485_v23  ;;  %v751_v63 = vld [vmem:[%s4995_s16 + $0x79] sm:$0xff]  ;;  %v752_v0 = vld [vmem:[%s4995_s16 + $0x81] sm:$0xff]  ;;  %v753_v5 = vld [vmem:[%s4995_s16 + $0x89] sm:$0x3f] }
  0x21   : > { %4318 = vmatprep.subr.mxu0 %v3719_v24  ;;  %4252 = vmatprep.mubr.msk.f32.mxu0 %vm508_vm0, %v486_v25  ;;  %v499_v2 = vld [vmem:[%s4995_s16 + $0x88] sm:$0x3f]  ;;  %v1269_v4 = vld [vmem:[%s6018_s3 + $0x38] sm:$0xff]  ;;  %v1270_v6 = vld [vmem:[%s6018_s3 + $0x40] sm:$0xff] }
  0x22   : > { %4319 = vmatpush3.msra.mxu0 %v3719_v24  ;;  %1282 = vperm.xlu0 %4859, %v1262_v46   ;;  %v990_v3 = vld [vmem:[%s4995_s16 + $0x2] sm:$0xff]  ;;  %v991_v7 = vld [vmem:[%s4995_s16 + $0xa] sm:$0xff]  ;;  %v992_v8 = vld [vmem:[%s4995_s16 + $0x12] sm:$0xff] }
  0x23   : > { %4293 = vmatmul.mubr.msk.f32.gmra.mxu1 %vm508_vm0, %v739_v26  ;;  %4320 = vmatprep.subr.mxu0 %v3718_v27  ;;  %v1271_v9 = vld [vmem:[%s6018_s3 + $0x48] sm:$0xff]  ;;  %v1272_v10 = vld [vmem:[%s6018_s3 + $0x50] sm:$0xff]  ;;  %v993_v11 = vld [vmem:[%s4995_s16 + $0x1a] sm:$0xff] }
  0x24   : > { %4295 = vmatprep.mubr.msk.f32.mxu1 %vm508_vm0, %v740_v28  ;;  %4321 = vmatpush3.msra.mxu0 %v3718_v27  ;;  %v994_v12 = vld [vmem:[%s4995_s16 + $0x22] sm:$0xff]  ;;  %v1273_v13 = vld [vmem:[%s6018_s3 + $0x58] sm:$0xff]  ;;  %v995_v15 = vld [vmem:[%s4995_s16 + $0x2a] sm:$0xff] }
  0x25   : > { %4253 = vmatmul.mubr.msk.f32.gmra.mxu0 %vm508_vm0, %v487_v29  ;;  %4322 = vmatprep.subr.mxu0 %v3717_v30  ;;  %v1274_v14 = vld [vmem:[%s6018_s3 + $0x60] sm:$0xff]  ;;  %v996_v16 = vld [vmem:[%s4995_s16 + $0x32] sm:$0xff]  ;;  %v1275_v17 = vld [vmem:[%s6018_s3 + $0x68] sm:$0xff] }
  0x26   : > { %4255 = vmatprep.mubr.msk.f32.mxu0 %vm508_vm0, %v488_v31  ;;  %4323 = vmatpush3.msra.mxu0 %v3717_v30  ;;  %v1276_v18 = vld [vmem:[%s6018_s3 + $0x70] sm:$0xff]  ;;  %v997_v19 = vld [vmem:[%s4995_s16 + $0x3a] sm:$0xff]  ;;  %v998_v20 = vld [vmem:[%s4995_s16 + $0x42] sm:$0xff] }
  0x27   : > { %4296 = vmatmul.mubr.msk.f32.gmra.mxu1 %vm508_vm0, %v741_v32  ;;  %4324 = vmatprep.subr.mxu0 %v3716_v33  ;;  %v1277_v21 = vld [vmem:[%s6018_s3 + $0x78] sm:$0xff]  ;;  %v1278_v22 = vld [vmem:[%s6018_s3 + $0x80] sm:$0xff]  ;;  %v999_v23 = vld [vmem:[%s4995_s16 + $0x4a] sm:$0xff] }
  0x28   : > { %4298 = vmatprep.mubr.msk.f32.mxu1 %vm508_vm0, %v742_v34  ;;  %4325 = vmatpush3.msra.mxu0 %v3716_v33  ;;  %v1000_v24 = vld [vmem:[%s4995_s16 + $0x52] sm:$0xff]  ;;  %v1279_v25 = vld [vmem:[%s6018_s3 + $0x88] sm:$0x3f]  ;;  %v2903_v26 = vld [vmem:[%s6025_s10] sm:$0xff] }
  0x29   : > { %4256 = vmatmul.mubr.msk.f32.gmra.mxu0 %vm508_vm0, %v489_v35  ;;  %4326 = vmatprep.subr.mxu0 %v3715_v36  ;;  %v1001_v27 = vld [vmem:[%s4995_s16 + $0x5a] sm:$0xff]  ;;  %v1002_v28 = vld [vmem:[%s4995_s16 + $0x62] sm:$0xff]  ;;  %v2905_v30 = vld [vmem:[%s6025_s10 + $0x10] sm:$0xff] }
  0x2a   : > { %4258 = vmatprep.mubr.msk.f32.mxu0 %vm508_vm0, %v490_v37  ;;  %4327 = vmatpush3.msra.mxu0 %v3715_v36  ;;  %v2904_v29 = vld [vmem:[%s6025_s10 + $0x8] sm:$0xff]  ;;  %v1004_v32 = vld [vmem:[%s4995_s16 + $0x72] sm:$0xff]  ;;  %v2907_v34 = vld [vmem:[%s6025_s10 + $0x20] sm:$0xff] }
  0x2b   : > { %4299 = vmatmul.mubr.msk.f32.gmra.mxu1 %vm508_vm0, %v743_v38  ;;  %4328 = vmatprep.subr.mxu0 %v3714_v39  ;;  %v1003_v31 = vld [vmem:[%s4995_s16 + $0x6a] sm:$0xff]  ;;  %v2906_v33 = vld [vmem:[%s6025_s10 + $0x18] sm:$0xff]  ;;  %v1006_v36 = vld [vmem:[%s4995_s16 + $0x82] sm:$0xff] }
  0x2c   : > { %4301 = vmatprep.mubr.msk.f32.mxu1 %vm508_vm0, %v744_v40  ;;  %4329 = vmatpush3.msra.mxu0 %v3714_v39  ;;  %v1005_v35 = vld [vmem:[%s4995_s16 + $0x7a] sm:$0xff]  ;;  %v2908_v37 = vld [vmem:[%s6025_s10 + $0x28] sm:$0xff]  ;;  %v2909_v38 = vld [vmem:[%s6025_s10 + $0x30] sm:$0xff] }
  0x2d   : > { %4259 = vmatmul.mubr.msk.f32.gmra.mxu0 %vm508_vm0, %v491_v41  ;;  %4330 = vmatprep.subr.mxu0 %v3713_v42  ;;  %v1007_v39 = vld [vmem:[%s4995_s16 + $0x8a] sm:$0x3f]  ;;  %v2910_v40 = vld [vmem:[%s6025_s10 + $0x38] sm:$0xff]  ;;  %v2911_v41 = vld [vmem:[%s6025_s10 + $0x40] sm:$0xff]  ;;  %s3666_s16 = sshll.u32 %s3660_s30, 3 }
  0x2e   : > { %4261 = vmatprep.mubr.msk.f32.mxu0 %vm508_vm0, %v492_v43  ;;  %4331 = vmatpush3.msra.mxu0 %v3713_v42  ;;  %v2912_v42 = vld [vmem:[%s6025_s10 + $0x48] sm:$0x3f]  ;;  %v3755_v43 = vld [vmem:[%s6019_s4 + $0xf8] sm:$0xff]  ;;  %p466_p4 = scmp.lt.s32.totalorder %s3666_s16, 15 }
  0x2f   : > { %4302 = vmatmul.mubr.msk.f32.gmra.mxu1 %vm508_vm0, %v745_v44  ;;  %4860 = vset.pattern.permute.xlu1 %v4869_v49  ;;  %v3754_v44 = vld [vmem:[%s6019_s4 + $0xf0] sm:$0xff]  ;;  %v1446_v46 = vld [vmem:[%s6019_s4 + $0x78] sm:$0xff] }
  0x30   : > { %4304 = vmatprep.mubr.msk.f32.mxu1 %vm508_vm0, %v746_v45  ;;  %1292 = vperm.xlu1 %4860, %v1264_v50   ;;  %v3753_v45 = vld [vmem:[%s6019_s4 + $0xe8] sm:$0xff]  ;;  %v3751_v49 = vld [vmem:[%s6019_s4 + $0xd8] sm:$0xff]  ;;  %s6033_s16 = smov (!%p466_p4, %s3666_s16), 15 }
  0x31   : > { %4262 = vmatmul.mubr.msk.f32.gmra.mxu0 %vm508_vm0, %v493_v47  ;;  %1287 = vperm.xlu0 %4859, %v1263_v53   ;;  %v3752_v47 = vld [vmem:[%s6019_s4 + $0xe0] sm:$0xff]  ;;  %v1444_v50 = vld [vmem:[%s6019_s4 + $0x68] sm:$0xff]  ;;  %s3667_s18 = sshll.u32 %s6033_s16, 3 }
  0x32   : > { %4264 = vmatprep.mubr.msk.f32.mxu0 %vm508_vm0, %v494_v48  ;;  %4418 = vmatprep.subr.mxu0 %v3755_v43  ;;  %v1445_v48 = vld [vmem:[%s6019_s4 + $0x70] sm:$0xff]  ;;  %v3749_v53 = vld [vmem:[%s6019_s4 + $0xc8] sm:$0xff]  ;;  %s469_s22 = scalar_lea.vmem %s6029_s14, %s3667_s18 }
  0x33   : > { %4305 = vmatmul.mubr.msk.f32.gmra.mxu1 %vm508_vm0, %v747_v51  ;;  %4359 = vmatprep.subr.mxu1 %v1446_v46  ;;  %v3750_v51 = vld [vmem:[%s6019_s4 + $0xd0] sm:$0xff] }
  0x34   : > { %4307 = vmatprep.mubr.msk.f32.mxu1 %vm508_vm0, %v748_v52  ;;  %1297 = vperm.xlu1 %4860, %v1265_v56   ;;  %v1443_v52 = vld [vmem:[%s6019_s4 + $0x60] sm:$0xff]  ;;  %v3747_v56 = vld [vmem:[%s6019_s4 + $0xb8] sm:$0xff] }
  0x35   : > { %4265 = vmatmul.mubr.msk.f32.gmra.mxu0 %vm508_vm0, %v495_v54  ;;  %1302 = vperm.xlu0 %4859, %v1266_v59   ;;  %v1442_v54 = vld [vmem:[%s6019_s4 + $0x58] sm:$0xff]  ;;  %v1440_v59 = vld [vmem:[%s6019_s4 + $0x48] sm:$0xff] }
  0x36   : > { %4267 = vmatprep.mubr.msk.f32.mxu0 %vm508_vm0, %v496_v55  ;;  %4360 = vmatpush3.msra.mxu1 %v1446_v46  ;;  %v3748_v55 = vld [vmem:[%s6019_s4 + $0xc0] sm:$0xff] }
  0x37   : > { %4308 = vmatmul.mubr.msk.f32.gmra.mxu1 %vm508_vm0, %v749_v57  ;;  %4361 = vmatprep.subr.mxu1 %v1445_v48  ;;  %v1441_v57 = vld [vmem:[%s6019_s4 + $0x50] sm:$0xff] }
  0x38   : > { %4310 = vmatprep.mubr.msk.f32.mxu1 %vm508_vm0, %v750_v58  ;;  %1307 = vperm.xlu1 %4860, %v1267_v62   ;;  %v3746_v58 = vld [vmem:[%s6019_s4 + $0xb0] sm:$0xff]  ;;  %v3744_v62 = vld [vmem:[%s6019_s4 + $0xa0] sm:$0xff] }
  0x39   : > { %4268 = vmatmul.mubr.msk.f32.gmra.mxu0 %vm508_vm0, %v497_v60  ;;  %1312 = vperm.xlu0 %4859, %v1268_v1   ;;  %v3745_v60 = vld [vmem:[%s6019_s4 + $0xa8] sm:$0xff]  ;;  %v1437_v1 = vld [vmem:[%s6019_s4 + $0x30] sm:$0xff] }
  0x3a   : > { %4270 = vmatprep.mubr.msk.f32.mxu0 %vm508_vm0, %v498_v61  ;;  %4362 = vmatpush3.msra.mxu1 %v1445_v48  ;;  %v1439_v61 = vld [vmem:[%s6019_s4 + $0x40] sm:$0xff] }
  0x3b   : > { %4311 = vmatmul.mubr.msk.f32.gmra.mxu1 %vm508_vm0, %v751_v63  ;;  %4363 = vmatprep.subr.mxu1 %v1444_v50  ;;  %v1438_v63 = vld [vmem:[%s6019_s4 + $0x38] sm:$0xff] }
  0x3c   : > { %4313 = vmatprep.mubr.msk.f32.mxu1 %vm508_vm0, %v752_v0  ;;  %1317 = vperm.xlu1 %4860, %v1269_v4   ;;  %v3743_v0 = vld [vmem:[%s6019_s4 + $0x98] sm:$0xff]  ;;  %v3741_v4 = vld [vmem:[%s6019_s4 + $0x88] sm:$0xff] }
  0x3d   : > { %4271 = vmatmul.mubr.msk.f32.gmra.mxu0 %vm508_vm0, %v499_v2  ;;  %1322 = vperm.xlu0 %4859, %v1270_v6   ;;  %v3742_v2 = vld [vmem:[%s6019_s4 + $0x90] sm:$0xff]  ;;  %v3740_v6 = vld [vmem:[%s6019_s4 + $0x80] sm:$0xff] }
  0x3e   : > { %4332 = vmatprep.mubr.msk.f32.mxu0 %vm508_vm0, %v990_v3  ;;  %4364 = vmatpush3.msra.mxu1 %v1444_v50  ;;  %v1436_v3 = vld [vmem:[%s6019_s4 + $0x28] sm:$0xff] }
  0x3f   : > { %4314 = vmatmul.mubr.msk.f32.gmra.mxu1 %vm508_vm0, %v753_v5  ;;  %4365 = vmatprep.subr.mxu1 %v1443_v52  ;;  %v1435_v5 = vld [vmem:[%s6019_s4 + $0x20] sm:$0xff] }
  0x40   : > { %1327 = vperm.xlu1 %4860, %v1271_v9   ;;  %4366 = vmatpush3.msra.mxu1 %v1443_v52  ;;  %v1433_v9 = vld [vmem:[%s6019_s4 + $0x10] sm:$0xff] }
  0x41   : > { %4333 = vmatmul.mubr.msk.f32.vlgmr.msra.gmra.mxu0 %vm508_vm0, %v991_v7  ;;  %1332 = vperm.xlu0 %4859, %v1272_v10   ;;  %v1434_v7 = vld [vmem:[%s6019_s4 + $0x18] sm:$0xff]  ;;  %v1432_v10 = vld [vmem:[%s6019_s4 + $0x8] sm:$0xff] }
  0x42   : > { %4335 = vmatprep.mubr.msk.f32.mxu0 %vm508_vm0, %v992_v8  ;;  %4419 = vmatpush3.msra.mxu0 %v3755_v43  ;;  %v4870_v8 = vmov 0.0  }
  0x43   : > { %4420 = vmatprep.subr.mxu0 %v3754_v44  ;;  %4367 = vmatprep.subr.mxu1 %v1442_v54  ;;  %471 = vst [vmem:[#allocation2] sm:$0x1] %v4870_v8  ;;  %472 = vst [vmem:[#allocation2 + $0x8f] sm:$0x1] %v4870_v8 }
  0x44   : > { %1337 = vperm.xlu1 %4860, %v1273_v13   ;;  %4421 = vmatpush3.msra.mxu0 %v3754_v44  ;;  %473 = vst [vmem:[#allocation4] sm:$0x1] %v4870_v8  ;;  %474 = vst [vmem:[#allocation4 + $0x4f] sm:$0x1] %v4870_v8 }
  0x45   : > { %4336 = vmatmul.mubr.msk.f32.gmra.mxu0 %vm508_vm0, %v993_v11  ;;  %1342 = vperm.xlu0 %4859, %v1274_v14   ;;  %v1431_v11 = vld [vmem:[%s6019_s4] sm:$0xff] }
  0x46   : > { %4338 = vmatprep.mubr.msk.f32.mxu0 %vm508_vm0, %v994_v12  ;;  %4422 = vmatprep.subr.mxu0 %v3753_v45  ;;  %v5329_v12 = vld [vmem:[%s6019_s4 + $0x178] sm:$0xff] }
  0x47   : > { %4423 = vmatpush3.msra.mxu0 %v3753_v45  ;;  %4368 = vmatpush3.msra.mxu1 %v1442_v54 }
  0x48   : > { %1347 = vperm.xlu1 %4860, %v1275_v17   ;;  %4424 = vmatprep.subr.mxu0 %v3752_v47 }
  0x49   : > { %4339 = vmatmul.mubr.msk.f32.gmra.mxu0 %vm508_vm0, %v995_v15  ;;  %1352 = vperm.xlu0 %4859, %v1276_v18  }
  0x4a   : > { %4341 = vmatprep.mubr.msk.f32.mxu0 %vm508_vm0, %v996_v16  ;;  %4425 = vmatpush3.msra.mxu0 %v3752_v47 }
  0x4b   : > { %4426 = vmatprep.subr.mxu0 %v3751_v49  ;;  %4369 = vmatprep.subr.mxu1 %v1441_v57 }
  0x4c   : > { %1357 = vperm.xlu1 %4860, %v1277_v21   ;;  %4427 = vmatpush3.msra.mxu0 %v3751_v49 }
  0x4d   : > { %4342 = vmatmul.mubr.msk.f32.gmra.mxu0 %vm508_vm0, %v997_v19  ;;  %1362 = vperm.xlu0 %4859, %v1278_v22  }
  0x4e   : > { %4344 = vmatprep.mubr.msk.f32.mxu0 %vm508_vm0, %v998_v20  ;;  %4428 = vmatprep.subr.mxu0 %v3750_v51 }
  0x4f   : > { %4429 = vmatpush3.msra.mxu0 %v3750_v51  ;;  %4370 = vmatpush3.msra.mxu1 %v1441_v57 }
  0x50   : > { %1367 = vperm.xlu1 %4860, %v1279_v25   ;;  %4430 = vmatprep.subr.mxu0 %v3749_v53 }
  0x51   : > { %4345 = vmatmul.mubr.msk.f32.gmra.mxu0 %vm508_vm0, %v999_v23  ;;  %2915 = vperm.xlu0 %4859, %v2903_v26  }
  0x52   : > { %4347 = vmatprep.mubr.msk.f32.mxu0 %vm508_vm0, %v1000_v24  ;;  %4431 = vmatpush3.msra.mxu0 %v3749_v53 }
  0x53   : > { %4432 = vmatprep.subr.mxu0 %v3748_v55  ;;  %4371 = vmatprep.subr.mxu1 %v1440_v59 }
  0x54   : > { %2920 = vperm.xlu1 %4860, %v2904_v29   ;;  %4433 = vmatpush3.msra.mxu0 %v3748_v55 }
  0x55   : > { %4348 = vmatmul.mubr.msk.f32.gmra.mxu0 %vm508_vm0, %v1001_v27  ;;  %2925 = vperm.xlu0 %4859, %v2905_v30  }
  0x56   : > { %4350 = vmatprep.mubr.msk.f32.mxu0 %vm508_vm0, %v1002_v28  ;;  %4434 = vmatprep.subr.mxu0 %v3747_v56 }
  0x57   : > { %4435 = vmatpush3.msra.mxu0 %v3747_v56  ;;  %4372 = vmatpush3.msra.mxu1 %v1440_v59 }
  0x58   : > { %2930 = vperm.xlu1 %4860, %v2906_v33   ;;  %4436 = vmatprep.subr.mxu0 %v3746_v58 }
  0x59   : > { %4351 = vmatmul.mubr.msk.f32.gmra.mxu0 %vm508_vm0, %v1003_v31  ;;  %2935 = vperm.xlu0 %4859, %v2907_v34  }
  0x5a   : > { %4353 = vmatprep.mubr.msk.f32.mxu0 %vm508_vm0, %v1004_v32  ;;  %4437 = vmatpush3.msra.mxu0 %v3746_v58 }
  0x5b   : > { %4438 = vmatprep.subr.mxu0 %v3745_v60  ;;  %4373 = vmatprep.subr.mxu1 %v1439_v61 }
  0x5c   : > { %2940 = vperm.xlu1 %4860, %v2908_v37   ;;  %4439 = vmatpush3.msra.mxu0 %v3745_v60  ;;  %v5347_v37 = vld [vmem:[%s6017_s2] ss:$0 sm:$0xff] }
  0x5d   : > { %4354 = vmatmul.mubr.msk.f32.gmra.mxu0 %vm508_vm0, %v1005_v35  ;;  %2945 = vperm.xlu0 %4859, %v2909_v38  }
  0x5e   : > { %4356 = vmatprep.mubr.msk.f32.mxu0 %vm508_vm0, %v1006_v36  ;;  %4440 = vmatprep.subr.mxu0 %v3744_v62 }
  0x5f   : > { %4374 = vmatpush3.msra.mxu1 %v1439_v61  ;;  %4441 = vmatpush3.msra.mxu0 %v3744_v62 }
  0x60   : > { %2950 = vperm.xlu1 %4860, %v2910_v40   ;;  %4375 = vmatprep.subr.mxu1 %v1438_v63 }
  0x61   : > { %4357 = vmatmul.mubr.msk.f32.gmra.mxu0 %vm508_vm0, %v1007_v39  ;;  %2955 = vperm.xlu0 %4859, %v2911_v41  }
  0x62   : > { %4442 = vmatprep.subr.mxu0 %v3743_v0  ;;  %4376 = vmatpush3.msra.mxu1 %v1438_v63 }
  0x63   : > { %4443 = vmatpush3.msra.mxu0 %v3743_v0  ;;  %4377 = vmatprep.subr.mxu1 %v1437_v1 }
  0x64   : > { %2960 = vperm.xlu1 %4860, %v2912_v42   ;;  %4444 = vmatprep.subr.mxu0 %v3742_v2 }
  0x65   : > { %4378 = vmatpush3.msra.mxu1 %v1437_v1  ;;  %4445 = vmatpush3.msra.mxu0 %v3742_v2 }
  0x66   : > { %4379 = vmatprep.subr.mxu1 %v1436_v3  ;;  %4446 = vmatprep.subr.mxu0 %v3741_v4 }
  0x67   : > { %4380 = vmatpush3.msra.mxu1 %v1436_v3  ;;  %4447 = vmatpush3.msra.mxu0 %v3741_v4 }
  0x68   : > { %4381 = vmatprep.subr.mxu1 %v1435_v5  ;;  %4448 = vmatprep.subr.mxu0 %v3740_v6 }
  0x69   : > { %4382 = vmatpush3.msra.mxu1 %v1435_v5  ;;  %4449 = vmatpush3.msra.mxu0 %v3740_v6 }
  0x6a   : > { %4383 = vmatprep.subr.mxu1 %v1434_v7  ;;  %2109 = vmatprep.subr.mxu0 %v4870_v8 }
  0x6b   : > { %4384 = vmatpush3.msra.mxu1 %v1434_v7 }
  0x6c   : > { %4385 = vmatprep.subr.mxu1 %v1433_v9 }
  0x6d   : > { %4386 = vmatpush3.msra.mxu1 %v1433_v9 }
  0x6e   : > { %4387 = vmatprep.subr.mxu1 %v1432_v10 }
  0x6f   : > { %4388 = vmatpush3.msra.mxu1 %v1432_v10 }
  0x70   : > { %4389 = vmatprep.subr.mxu1 %v1431_v11 }
  0x71   : > { %4390 = vmatpush3.msra.mxu1 %v1431_v11 }
  0x72   : > { %4477 = vmatprep.subr.mxu1 %v5329_v12 }
  0x9d   : > { %v1283_v34 = vpop.permute.xlu0 %1282 }
  0xab   : > { %v1293_v32 = vpop.permute.xlu1 %1292 }
  0xac   : > { %v1288_v42 = vpop.permute.xlu0 %1287 }
  0xaf   : > { %v1298_v39 = vpop.permute.xlu1 %1297 }
  0xb0   : > { %v1303_v53 = vpop.permute.xlu0 %1302 }
  0xb3   : > { %v1308_v48 = vpop.permute.xlu1 %1307 }
  0xb4   : > { %v5372_v9 = vpop.permute.xlu0 %1312 }
  0xb7   : > { %v1318_v0 = vpop.permute.xlu1 %1317 }
  0xdc   : > { %v4248_v13 = vpop.f32.mrf.mxu0 }
  0xdd   : > { %v719_v43 = vadd.f32 %v4248_v13, %v5347_v37 }
  0xde   : > { %v629_v14 = vpop.f32.mrf.mxu0 }
  0xdf   : > { %v4291_v15 = vpop.f32.mrf.mxu1  ;;  %v718_v45 = vadd.f32 %v5347_v37, %v629_v14 }
  0xe0   : > { %v4251_v16 = vpop.f32.mrf.mxu0  ;;  %v973_v49 = vadd.f32 %v4291_v15, %v719_v43 }
  0xe1   : > { %v883_v17 = vpop.f32.mrf.mxu1  ;;  %v721_v50 = vadd.f32 %v4251_v16, %v5347_v37 }
  0xe2   : > { %v639_v18 = vpop.f32.mrf.mxu0  ;;  %v972_v54 = vadd.f32 %v883_v17, %v718_v45 }
  0xe3   : > { %v4294_v19 = vpop.f32.mrf.mxu1  ;;  %v720_v51 = vadd.f32 %v5347_v37, %v639_v18 }
  0xe4   : > { %v975_v58 = vadd.f32 %v4294_v19, %v721_v50 }
  0xe5   : > { %v4254_v20 = vpop.f32.mrf.mxu0  ;;  %v893_v21 = vpop.f32.mrf.mxu1 }
  0xe6   : > { %v723_v59 = vadd.f32 %v4254_v20, %v5347_v37  ;;  %v974_v62 = vadd.f32 %v893_v21, %v720_v51 }
  0xe7   : > { %v649_v22 = vpop.f32.mrf.mxu0  ;;  %v4297_v24 = vpop.f32.mrf.mxu1 }
  0xe8   : > { %v722_v1 = vadd.f32 %v5347_v37, %v649_v22  ;;  %v977_v10 = vadd.f32 %v4297_v24, %v723_v59 }
  0xe9   : > { %v4257_v23 = vpop.f32.mrf.mxu0  ;;  %v903_v27 = vpop.f32.mrf.mxu1 }
  0xea   : > { %v725_v5 = vadd.f32 %v4257_v23, %v5347_v37  ;;  %v976_v17 = vadd.f32 %v903_v27, %v722_v1 }
  0xeb   : > { %v659_v25 = vpop.f32.mrf.mxu0  ;;  %v4300_v30 = vpop.f32.mrf.mxu1 }
  0xec   : > { %v724_v15 = vadd.f32 %v5347_v37, %v659_v25  ;;  %v979_v21 = vadd.f32 %v4300_v30, %v725_v5  ;;  %v3769_v5 = vld [vmem:[%s6019_s4 + $0x168] sm:$0xff] }
  0xed   : > { %v5332_v26 = vpop.f32.mrf.mxu0  ;;  %v913_v35 = vpop.f32.mrf.mxu1 }
  0xee   : > { %v727_v24 = vadd.f32 %v5332_v26, %v5347_v37  ;;  %v978_v45 = vadd.f32 %v913_v35, %v724_v15 }
  0xef   : > { %v5334_v28 = vpop.f32.mrf.mxu0  ;;  %v5351_v40 = vpop.f32.mrf.mxu1 }
  0xf0   : > { %v981_v35 = vadd.f32 %v5351_v40, %v727_v24  ;;  %v3770_v40 = vld [vmem:[%s6019_s4 + $0x170] sm:$0xff] }
  0xf1   : > { %v5336_v29 = vpop.f32.mrf.mxu0  ;;  %v5359_v46 = vpop.f32.mrf.mxu1 }
  0xf3   : > { %v5338_v31 = vpop.f32.mrf.mxu0  ;;  %v5365_v56 = vpop.f32.mrf.mxu1 }
  0xf5   : > { %v5340_v33 = vpop.f32.mrf.mxu0  ;;  %v5370_v6 = vpop.f32.mrf.mxu1 }
  0xf7   : > { %v5342_v36 = vpop.f32.mrf.mxu0  ;;  %v5375_v22 = vpop.f32.mrf.mxu1 }
  0xf9   : > { %v5349_v38 = vpop.f32.mrf.mxu0  ;;  %v5385_v26 = vpop.f32.mrf.mxu1 }
  0xfb   : > { %v5353_v41 = vpop.f32.mrf.mxu0  ;;  %v4312_v1 = vpop.f32.mrf.mxu1 }
  0xfd   : > { %v5356_v44 = vpop.f32.mrf.mxu0  ;;  %v953_v15 = vpop.f32.mrf.mxu1 }
  0xff   : > { %v5361_v47 = vpop.f32.mrf.mxu0 }
 0x101   : > { %v4334_v52 = vpop.f32.mrf.mxu0 }
 0x102   : > { %v1227_v55 = vadd.f32 %v4334_v52, %v973_v49  ;;  %v5379_v49 = vpop.permute.xlu0 %1322  ;;  %v729_v52 = vadd.f32 %v5336_v29, %v5347_v37 }
 0x103   : > { %v1137_v57 = vpop.f32.mrf.mxu0 }
 0x104   : > { %v1245_v60 = vmax.f32 %v1227_v55, 0.0  ;;  %v1226_v61 = vadd.f32 %v1137_v57, %v972_v54 }
 0x105   : > { %v4337_v63 = vpop.f32.mrf.mxu0 }
 0x106   : > { %v1371_v2 = vmul.f32 %v1288_v42, %v1245_v60  ;;  %v1244_v3 = vmax.f32 %v1226_v61, 0.0  ;;  %v1229_v4 = vadd.f32 %v4337_v63, %v975_v58  ;;  %v1328_v42 = vpop.permute.xlu1 %1327 }
 0x107   : > { %v1147_v7 = vpop.f32.mrf.mxu0 }
 0x108   : > { %1389 = vst [vmem:[#allocation2 + $0x9] sm:$0xff] %v1371_v2  ;;  %v1370_v11 = vmul.f32 %v1283_v34, %v1244_v3  ;;  %v1247_v13 = vmax.f32 %v1229_v4, 0.0  ;;  %v1228_v14 = vadd.f32 %v1147_v7, %v974_v62 }
 0x109   : > { %v4340_v16 = vpop.f32.mrf.mxu0 }
 0x10a   : > { %1388 = vst [vmem:[#allocation2 + $0x1] sm:$0xff] %v1370_v11  ;;  %v1373_v18 = vmul.f32 %v1298_v39, %v1247_v13  ;;  %v1246_v19 = vmax.f32 %v1228_v14, 0.0  ;;  %v1231_v20 = vadd.f32 %v4340_v16, %v977_v10  ;;  %4450 = vmatprep.mubr.f32.mxu0 %v1370_v11  ;;  %v726_v39 = vadd.f32 %v5347_v37, %v5334_v28  ;;  %v1338_v60 = vpop.permute.xlu1 %1337 }
 0x10b   : > { %v1157_v23 = vpop.f32.mrf.mxu0  ;;  %4451 = vmatmul.mubr.f32.vlgmr.msra.gmra.mxu0 %v1371_v2  ;;  %v728_v28 = vadd.f32 %v5347_v37, %v5338_v31  ;;  %v1333_v2 = vpop.permute.xlu0 %1332 }
 0x10c   : > { %1391 = vst [vmem:[#allocation2 + $0x19] sm:$0xff] %v1373_v18  ;;  %v1372_v34 = vmul.f32 %v1293_v32, %v1246_v19  ;;  %v1249_v43 = vmax.f32 %v1231_v20, 0.0  ;;  %v1230_v25 = vadd.f32 %v1157_v23, %v976_v17  ;;  %v980_v61 = vadd.f32 %v5359_v46, %v726_v39 }
 0x10d   : > { %v4343_v27 = vpop.f32.mrf.mxu0  ;;  %v731_v46 = vadd.f32 %v5340_v33, %v5347_v37  ;;  %v730_v33 = vadd.f32 %v5347_v37, %v5342_v36 }
 0x10e   : > { %1390 = vst [vmem:[#allocation2 + $0x11] sm:$0xff] %v1372_v34  ;;  %v1375_v30 = vmul.f32 %v1308_v48, %v1249_v43  ;;  %v1248_v50 = vmax.f32 %v1230_v25, 0.0  ;;  %v1233_v51 = vadd.f32 %v4343_v27, %v979_v21  ;;  %4453 = vmatprep.mubr.f32.mxu0 %v1372_v34  ;;  %v1348_v17 = vpop.permute.xlu1 %1347  ;;  %v3767_v21 = vld [vmem:[%s6019_s4 + $0x158] sm:$0xff]  ;;  %v3766_v27 = vld [vmem:[%s6019_s4 + $0x150] sm:$0xff] }
 0x10f   : > { %v1167_v32 = vpop.f32.mrf.mxu0  ;;  %4454 = vmatmul.mubr.f32.gmra.mxu0 %v1373_v18  ;;  %v985_v36 = vadd.f32 %v5375_v22, %v731_v46  ;;  %v1343_v22 = vpop.permute.xlu0 %1342  ;;  %v984_v34 = vadd.f32 %v5385_v26, %v730_v33  ;;  %v3765_v26 = vld [vmem:[%s6019_s4 + $0x148] sm:$0xff] }
 0x110   : > { %1393 = vst [vmem:[#allocation2 + $0x29] sm:$0xff] %v1375_v30  ;;  %v1374_v54 = vmul.f32 %v1303_v53, %v1248_v50  ;;  %v1251_v55 = vmax.f32 %v1233_v51, 0.0  ;;  %v1232_v57 = vadd.f32 %v1167_v32, %v978_v45  ;;  %v983_v53 = vadd.f32 %v5365_v56, %v729_v52 }
 0x111   : > { %v4346_v48 = vpop.f32.mrf.mxu0  ;;  %v1413_v58 = vld [vmem:[#allocation2] sm:$0xff]  ;;  %v1414_v59 = vld [vmem:[#allocation2 + $0x8] sm:$0xff]  ;;  %v982_v56 = vadd.f32 %v5370_v6, %v728_v28  ;;  %v733_v6 = vadd.f32 %v5349_v38, %v5347_v37  ;;  %v732_v38 = vadd.f32 %v5347_v37, %v5353_v41  ;;  %v4315_v41 = vpop.f32.mrf.mxu1 }
 0x112   : > { %1392 = vst [vmem:[#allocation2 + $0x21] sm:$0xff] %v1374_v54  ;;  %v1377_v29 = vmul.f32 %v1318_v0, %v1251_v55  ;;  %v1250_v62 = vmax.f32 %v1232_v57, 0.0  ;;  %v1235_v63 = vadd.f32 %v4346_v48, %v981_v35  ;;  %4391 = vmatprep.mubr.f32.mxu1 %v1413_v58  ;;  %4456 = vmatprep.mubr.f32.mxu0 %v1374_v54  ;;  %v1358_v57 = vpop.permute.xlu1 %1357 }
 0x113   : > { %v1177_v31 = vpop.f32.mrf.mxu0  ;;  %4392 = vmatmul.mubr.f32.vlgmr.msra.gmra.mxu1 %v1414_v59  ;;  %4457 = vmatmul.mubr.f32.gmra.mxu0 %v1375_v30  ;;  %v735_v30 = vadd.f32 %v5356_v44, %v5347_v37  ;;  %v986_v32 = vadd.f32 %v953_v15, %v732_v38  ;;  %v734_v44 = vadd.f32 %v5347_v37, %v5361_v47  ;;  %v3764_v59 = vld [vmem:[%s6019_s4 + $0x140] sm:$0xff]  ;;  %v3763_v37 = vld [vmem:[%s6019_s4 + $0x138] sm:$0xff]  ;;  %v1353_v47 = vpop.permute.xlu0 %1352 }
 0x114   : > { %1395 = vst [vmem:[#allocation2 + $0x39] sm:$0xff] %v1377_v29  ;;  %v1376_v0 = vmul.f32 %v5372_v9, %v1250_v62  ;;  %v1253_v3 = vmax.f32 %v1235_v63, 0.0  ;;  %v1234_v4 = vadd.f32 %v1177_v31, %v980_v61  ;;  %4478 = vmatpush3.msra.mxu1 %v5329_v12  ;;  %v3768_v12 = vld [vmem:[%s6019_s4 + $0x160] sm:$0xff] }
 0x115   : > { %v4349_v7 = vpop.f32.mrf.mxu0  ;;  %v1415_v10 = vld [vmem:[#allocation2 + $0x10] sm:$0xff]  ;;  %4479 = vmatprep.subr.mxu1 %v3770_v40  ;;  %v1416_v11 = vld [vmem:[#allocation2 + $0x18] sm:$0xff] }
 0x116   : > { %1394 = vst [vmem:[#allocation2 + $0x31] sm:$0xff] %v1376_v0  ;;  %v1379_v13 = vmul.f32 %v1328_v42, %v1253_v3  ;;  %v1252_v9 = vmax.f32 %v1234_v4, 0.0  ;;  %v1237_v14 = vadd.f32 %v4349_v7, %v983_v53  ;;  %4394 = vmatprep.mubr.f32.mxu1 %v1415_v10  ;;  %4480 = vmatpush3.msra.mxu1 %v3770_v40  ;;  %v3762_v4 = vld [vmem:[%s6019_s4 + $0x130] sm:$0xff]  ;;  %v1368_v33 = vpop.permute.xlu1 %1367 }
 0x117   : > { %v1187_v16 = vpop.f32.mrf.mxu0  ;;  %4395 = vmatmul.mubr.f32.gmra.mxu1 %v1416_v11  ;;  %4481 = vmatprep.subr.mxu1 %v3769_v5  ;;  %v3761_v11 = vld [vmem:[%s6019_s4 + $0x128] sm:$0xff]  ;;  %v1363_v15 = vpop.permute.xlu0 %1362 }
 0x118   : > { %1397 = vst [vmem:[#allocation2 + $0x49] sm:$0xff] %v1379_v13  ;;  %v1378_v18 = vmul.f32 %v5379_v49, %v1252_v9  ;;  %v1255_v19 = vmax.f32 %v1237_v14, 0.0  ;;  %v1236_v20 = vadd.f32 %v1187_v16, %v982_v56  ;;  %4482 = vmatpush3.msra.mxu1 %v3769_v5  ;;  %4459 = vmatprep.mubr.f32.mxu0 %v1376_v0 }
 0x119   : > { %v4352_v23 = vpop.f32.mrf.mxu0  ;;  %v1417_v42 = vld [vmem:[#allocation2 + $0x20] sm:$0xff]  ;;  %4483 = vmatprep.subr.mxu1 %v3768_v12  ;;  %v1418_v24 = vld [vmem:[#allocation2 + $0x28] sm:$0xff]  ;;  %4460 = vmatmul.mubr.f32.gmra.mxu0 %v1377_v29  ;;  %v987_v49 = vadd.f32 %v4312_v1, %v733_v6  ;;  %v989_v29 = vadd.f32 %v4315_v41, %v735_v30 }
 0x11a   : > { %1396 = vst [vmem:[#allocation2 + $0x41] sm:$0xff] %v1378_v18  ;;  %v1381_v43 = vmul.f32 %v1338_v60, %v1255_v19  ;;  %v1254_v25 = vmax.f32 %v1236_v20, 0.0  ;;  %v1239_v45 = vadd.f32 %v4352_v23, %v985_v36  ;;  %4397 = vmatprep.mubr.f32.mxu1 %v1417_v42  ;;  %4484 = vmatpush3.msra.mxu1 %v3768_v12  ;;  %v963_v60 = vpop.f32.mrf.mxu1  ;;  %v3760_v6 = vld [vmem:[%s6019_s4 + $0x120] sm:$0xff]  ;;  %v3758_v19 = vld [vmem:[%s6019_s4 + $0x110] sm:$0xff]  ;;  %v3757_v20 = vld [vmem:[%s6019_s4 + $0x108] sm:$0xff] }
 0x11b   : > { %v1197_v39 = vpop.f32.mrf.mxu0  ;;  %4398 = vmatmul.mubr.f32.gmra.mxu1 %v1418_v24  ;;  %4485 = vmatprep.subr.mxu1 %v3767_v21  ;;  %v3756_v23 = vld [vmem:[%s6019_s4 + $0x100] sm:$0xff] }
 0x11c   : > { %1399 = vst [vmem:[#allocation2 + $0x59] sm:$0xff] %v1381_v43  ;;  %v1380_v50 = vmul.f32 %v1333_v2, %v1254_v25  ;;  %v1257_v51 = vmax.f32 %v1239_v45, 0.0  ;;  %v1238_v52 = vadd.f32 %v1197_v39, %v984_v34  ;;  %4486 = vmatpush3.msra.mxu1 %v3767_v21  ;;  %4462 = vmatprep.mubr.f32.mxu0 %v1378_v18  ;;  %v1828_v34 = vld [vmem:[#allocation2 + $0x2] sm:$0xff]  ;;  %v1830_v25 = vld [vmem:[#allocation2 + $0x12] sm:$0xff]  ;;  %v1831_v45 = vld [vmem:[#allocation2 + $0x1a] sm:$0xff] }
 0x11d   : > { %v4355_v35 = vpop.f32.mrf.mxu0  ;;  %v1419_v54 = vld [vmem:[#allocation2 + $0x30] sm:$0xff]  ;;  %v1420_v55 = vld [vmem:[#allocation2 + $0x38] sm:$0xff]  ;;  %4487 = vmatprep.subr.mxu1 %v3766_v27  ;;  %4463 = vmatmul.mubr.f32.gmra.mxu0 %v1379_v13  ;;  %v988_v2 = vadd.f32 %v963_v60, %v734_v44  ;;  %v2055_v44 = vld [vmem:[%s6021_s6 + $0x8] sm:$0xff] }
 0x11e   : > { %1398 = vst [vmem:[#allocation2 + $0x51] sm:$0xff] %v1380_v50  ;;  %v1383_v28 = vmul.f32 %v1348_v17, %v1257_v51  ;;  %v1256_v48 = vmax.f32 %v1238_v52, 0.0  ;;  %v1241_v58 = vadd.f32 %v4355_v35, %v987_v49  ;;  %4400 = vmatprep.mubr.f32.mxu1 %v1419_v54  ;;  %4488 = vmatpush3.msra.mxu1 %v3766_v27  ;;  %v3759_v17 = vld [vmem:[%s6019_s4 + $0x118] sm:$0xff]  ;;  %v1832_v27 = vld [vmem:[#allocation2 + $0x22] sm:$0xff]  ;;  %v1833_v49 = vld [vmem:[#allocation2 + $0x2a] sm:$0xff] }
 0x11f   : > { %v1207_v61 = vpop.f32.mrf.mxu0  ;;  %4401 = vmatmul.mubr.f32.gmra.mxu1 %v1420_v55  ;;  %4489 = vmatprep.subr.mxu1 %v3765_v26  ;;  %v1834_v41 = vld [vmem:[#allocation2 + $0x32] sm:$0xff] }
 0x120   : > { %1401 = vst [vmem:[#allocation2 + $0x69] sm:$0xff] %v1383_v28  ;;  %v1382_v62 = vmul.f32 %v1343_v22, %v1256_v48  ;;  %v1259_v63 = vmax.f32 %v1241_v58, 0.0  ;;  %v1240_v40 = vadd.f32 %v1207_v61, %v986_v32  ;;  %4490 = vmatpush3.msra.mxu1 %v3765_v26  ;;  %4465 = vmatprep.mubr.f32.mxu0 %v1380_v50 }
 0x121   : > { %v4358_v53 = vpop.f32.mrf.mxu0  ;;  %v1421_v1 = vld [vmem:[#allocation2 + $0x40] sm:$0xff]  ;;  %v1422_v31 = vld [vmem:[#allocation2 + $0x48] sm:$0xff]  ;;  %4491 = vmatprep.subr.mxu1 %v3764_v59  ;;  %4466 = vmatmul.mubr.f32.gmra.mxu0 %v1381_v43 }
 0x122   : > { %1400 = vst [vmem:[#allocation2 + $0x61] sm:$0xff] %v1382_v62  ;;  %v1385_v46 = vmul.f32 %v1358_v57, %v1259_v63  ;;  %v1258_v0 = vmax.f32 %v1240_v40, 0.0  ;;  %v1243_v3 = vadd.f32 %v4358_v53, %v989_v29  ;;  %4403 = vmatprep.mubr.f32.mxu1 %v1421_v1  ;;  %4492 = vmatpush3.msra.mxu1 %v3764_v59  ;;  %v1829_v43 = vld [vmem:[#allocation2 + $0xa] sm:$0xff]  ;;  %v1835_v39 = vld [vmem:[#allocation2 + $0x3a] sm:$0xff]  ;;  %v1836_v30 = vld [vmem:[#allocation2 + $0x42] sm:$0xff] }
 0x123   : > { %v1217_v5 = vpop.f32.mrf.mxu0  ;;  %4404 = vmatmul.mubr.f32.gmra.mxu1 %v1422_v31  ;;  %4493 = vmatprep.subr.mxu1 %v3763_v37  ;;  %v2237_v1 = vld [vmem:[%s6022_s7 + $0x68] sm:$0xff] }
 0x124   : > { %1403 = vst [vmem:[#allocation2 + $0x79] sm:$0xff] %v1385_v46  ;;  %v1384_v56 = vmul.f32 %v1353_v47, %v1258_v0  ;;  %v1261_v7 = vmax.f32 %v1243_v3, 0.0  ;;  %v1242_v10 = vadd.f32 %v1217_v5, %v988_v2  ;;  %4494 = vmatpush3.msra.mxu1 %v3763_v37  ;;  %4468 = vmatprep.mubr.f32.mxu0 %v1382_v62  ;;  %v2239_v37 = vld [vmem:[%s6022_s7 + $0x78] sm:$0xff]  ;;  %v2238_v47 = vld [vmem:[%s6022_s7 + $0x70] sm:$0xff] }
 0x125   : > { %v1423_v13 = vld [vmem:[#allocation2 + $0x50] sm:$0xff]  ;;  %v1424_v9 = vld [vmem:[#allocation2 + $0x58] sm:$0xff]  ;;  %4495 = vmatprep.subr.mxu1 %v3762_v4  ;;  %4469 = vmatmul.mubr.f32.gmra.mxu0 %v1383_v28 }
 0x126   : > { %1402 = vst [vmem:[#allocation2 + $0x71] sm:$0xff] %v1384_v56  ;;  %v1387_v14 = vmul.f32 %v1368_v33, %v1261_v7  ;;  %v1260_v12 = vmax.f32 %v1242_v10, 0.0  ;;  %4406 = vmatprep.mubr.f32.mxu1 %v1423_v13  ;;  %4496 = vmatpush3.msra.mxu1 %v3762_v4  ;;  %v1837_v50 = vld [vmem:[#allocation2 + $0x4a] sm:$0xff]  ;;  %v1838_v51 = vld [vmem:[#allocation2 + $0x52] sm:$0xff]  ;;  %v2232_v13 = vld [vmem:[%s6022_s7 + $0x40] sm:$0xff] }
 0x127   : > { %4407 = vmatmul.mubr.f32.gmra.mxu1 %v1424_v9  ;;  %4497 = vmatprep.subr.mxu1 %v3761_v11  ;;  %v2235_v3 = vld [vmem:[%s6022_s7 + $0x58] sm:$0xff]  ;;  %v2233_v10 = vld [vmem:[%s6022_s7 + $0x48] sm:$0xff] }
 0x128   : > { %1405 = vst [vmem:[#allocation2 + $0x89] sm:$0x3f] %v1387_v14  ;;  %v1386_v16 = vmul.f32 %v1363_v15, %v1260_v12  ;;  %4498 = vmatpush3.msra.mxu1 %v3761_v11  ;;  %4471 = vmatprep.mubr.f32.mxu0 %v1384_v56  ;;  %v2234_v56 = vld [vmem:[%s6022_s7 + $0x50] sm:$0xff]  ;;  %v2231_v14 = vld [vmem:[%s6022_s7 + $0x38] sm:$0xff] }
 0x129   : > { %v1425_v36 = vld [vmem:[#allocation2 + $0x60] sm:$0xff]  ;;  %v1426_v18 = vld [vmem:[#allocation2 + $0x68] sm:$0xff]  ;;  %4499 = vmatprep.subr.mxu1 %v3760_v6  ;;  %4472 = vmatmul.mubr.f32.gmra.mxu0 %v1385_v46  ;;  %v2230_v15 = vld [vmem:[%s6022_s7 + $0x30] sm:$0xff] }
 0x12a   : > { %1404 = vst [vmem:[#allocation2 + $0x81] sm:$0xff] %v1386_v16  ;;  %4409 = vmatprep.mubr.f32.mxu1 %v1425_v36  ;;  %4500 = vmatpush3.msra.mxu1 %v3760_v6  ;;  %v1839_v52 = vld [vmem:[#allocation2 + $0x5a] sm:$0xff]  ;;  %v1840_v26 = vld [vmem:[#allocation2 + $0x62] sm:$0xff] }
 0x12b   : > { %4410 = vmatmul.mubr.f32.gmra.mxu1 %v1426_v18  ;;  %4501 = vmatprep.subr.mxu1 %v3759_v17  ;;  %v2236_v46 = vld [vmem:[%s6022_s7 + $0x60] sm:$0xff] }
 0x12c   : > { %4502 = vmatpush3.msra.mxu1 %v3759_v17  ;;  %4474 = vmatprep.mubr.f32.mxu0 %v1386_v16  ;;  %v2229_v17 = vld [vmem:[%s6022_s7 + $0x28] sm:$0xff] }
 0x12d   : > { %v1427_v21 = vld [vmem:[#allocation2 + $0x70] sm:$0xff]  ;;  %v1428_v38 = vld [vmem:[#allocation2 + $0x78] sm:$0xff]  ;;  %4503 = vmatprep.subr.mxu1 %v3758_v19 }
 0x12e   : > { %4412 = vmatprep.mubr.f32.mxu1 %v1427_v21  ;;  %4504 = vmatpush3.msra.mxu1 %v3758_v19  ;;  %v1841_v32 = vld [vmem:[#allocation2 + $0x6a] sm:$0xff]  ;;  %v1842_v35 = vld [vmem:[#allocation2 + $0x72] sm:$0xff]  ;;  %v2228_v19 = vld [vmem:[%s6022_s7 + $0x20] sm:$0xff] }
 0x12f   : > { %4413 = vmatmul.mubr.f32.gmra.mxu1 %v1428_v38  ;;  %v1637_v42 = vld [vmem:[#allocation2 + $0x89] sm:$0x3f]  ;;  %4505 = vmatprep.subr.mxu1 %v3757_v20  ;;  %v2227_v21 = vld [vmem:[%s6022_s7 + $0x18] sm:$0xff] }
 0x130   : > { %4475 = vmatmul.mubr.f32.gmra.mxu0 %v1637_v42  ;;  %4506 = vmatpush3.msra.mxu1 %v3757_v20  ;;  %v1845_v57 = vld [vmem:[#allocation2 + $0x8a] sm:$0x3f]  ;;  %v2226_v42 = vld [vmem:[%s6022_s7 + $0x10] sm:$0xff] }
 0x131   : > { %v1429_v24 = vld [vmem:[#allocation2 + $0x80] sm:$0xff]  ;;  %v1430_v22 = vld [vmem:[#allocation2 + $0x88] sm:$0x3f]  ;;  %4507 = vmatprep.subr.mxu1 %v3756_v23  ;;  %3773 = vmatprep.mubr.msk.f32.mxu0 %vm2074_vm1, %v2055_v44 }
 0x132   : > { %4415 = vmatprep.mubr.f32.mxu1 %v1429_v24  ;;  %4508 = vmatpush3.msra.mxu1 %v3756_v23  ;;  %v1843_v54 = vld [vmem:[#allocation2 + $0x7a] sm:$0xff]  ;;  %v1844_v55 = vld [vmem:[#allocation2 + $0x82] sm:$0xff] }
 0x133   : > { %4416 = vmatmul.mubr.f32.gmra.mxu1 %v1430_v22  ;;  %4536 = vmatprep.subr.mxu1 %v2239_v37 }
 0x134   : > { %4509 = vmatprep.mubr.f32.mxu1 %v1828_v34 }
 0x137   : > { %4510 = vmatmul.mubr.f32.vlgmr.msra.gmra.mxu1 %v1829_v43 }
 0x138   : > { %4512 = vmatprep.mubr.f32.mxu1 %v1830_v25  ;;  %4537 = vmatpush3.msra.mxu1 %v2239_v37 }
 0x139   : > { %4538 = vmatprep.subr.mxu1 %v2238_v47 }
 0x13a   : > { %4539 = vmatpush3.msra.mxu1 %v2238_v47 }
 0x13b   : > { %4513 = vmatmul.mubr.f32.gmra.mxu1 %v1831_v45  ;;  %4540 = vmatprep.subr.mxu1 %v2237_v1 }
 0x13c   : > { %4515 = vmatprep.mubr.f32.mxu1 %v1832_v27  ;;  %4541 = vmatpush3.msra.mxu1 %v2237_v1 }
 0x13d   : > { %4542 = vmatprep.subr.mxu1 %v2236_v46 }
 0x13e   : > { %4543 = vmatpush3.msra.mxu1 %v2236_v46 }
 0x13f   : > { %4516 = vmatmul.mubr.f32.gmra.mxu1 %v1833_v49  ;;  %4544 = vmatprep.subr.mxu1 %v2235_v3 }
 0x140   : > { %4518 = vmatprep.mubr.f32.mxu1 %v1834_v41  ;;  %4545 = vmatpush3.msra.mxu1 %v2235_v3 }
 0x141   : > { %4546 = vmatprep.subr.mxu1 %v2234_v56 }
 0x142   : > { %4547 = vmatpush3.msra.mxu1 %v2234_v56 }
 0x143   : > { %4519 = vmatmul.mubr.f32.gmra.mxu1 %v1835_v39  ;;  %4548 = vmatprep.subr.mxu1 %v2233_v10 }
 0x144   : > { %4521 = vmatprep.mubr.f32.mxu1 %v1836_v30  ;;  %4549 = vmatpush3.msra.mxu1 %v2233_v10 }
 0x145   : > { %4550 = vmatprep.subr.mxu1 %v2232_v13 }
 0x146   : > { %4551 = vmatpush3.msra.mxu1 %v2232_v13 }
 0x147   : > { %4522 = vmatmul.mubr.f32.gmra.mxu1 %v1837_v50  ;;  %4552 = vmatprep.subr.mxu1 %v2231_v14 }
 0x148   : > { %4524 = vmatprep.mubr.f32.mxu1 %v1838_v51  ;;  %4553 = vmatpush3.msra.mxu1 %v2231_v14 }
 0x149   : > { %4554 = vmatprep.subr.mxu1 %v2230_v15 }
 0x14a   : > { %4555 = vmatpush3.msra.mxu1 %v2230_v15 }
 0x14b   : > { %4525 = vmatmul.mubr.f32.gmra.mxu1 %v1839_v52  ;;  %4556 = vmatprep.subr.mxu1 %v2229_v17 }
 0x14c   : > { %4527 = vmatprep.mubr.f32.mxu1 %v1840_v26  ;;  %4557 = vmatpush3.msra.mxu1 %v2229_v17 }
 0x14d   : > { %4558 = vmatprep.subr.mxu1 %v2228_v19 }
 0x14e   : > { %4559 = vmatpush3.msra.mxu1 %v2228_v19 }
 0x14f   : > { %4528 = vmatmul.mubr.f32.gmra.mxu1 %v1841_v32  ;;  %4560 = vmatprep.subr.mxu1 %v2227_v21  ;;  %v5562_v32 = vld [vmem:[%s6020_s5] ss:$0 sm:$0xff] }
 0x150   : > { %4530 = vmatprep.mubr.f32.mxu1 %v1842_v35  ;;  %4561 = vmatpush3.msra.mxu1 %v2227_v21 }
 0x151   : > { %4562 = vmatprep.subr.mxu1 %v2226_v42 }
 0x152   : > { %4563 = vmatpush3.msra.mxu1 %v2226_v42 }
 0x153   : > { %4531 = vmatmul.mubr.f32.gmra.mxu1 %v1843_v54 }
 0x154   : > { %4533 = vmatprep.mubr.f32.mxu1 %v1844_v55 }
 0x157   : > { %4534 = vmatmul.mubr.f32.gmra.mxu1 %v1845_v57 }
 0x1cb   : > { %v5463_v58 = vpop.f32.mrf.mxu0 }
 0x1cd   : > { %v5469_v61 = vpop.f32.mrf.mxu0 }
 0x1cf   : > { %v5475_v63 = vpop.f32.mrf.mxu0 }
 0x1d1   : > { %v5490_v31 = vpop.f32.mrf.mxu0 }
 0x1d3   : > { %v5459_v28 = vpop.f32.mrf.mxu1  ;;  %v5502_v4 = vpop.f32.mrf.mxu0 }
 0x1d5   : > { %v5461_v48 = vpop.f32.mrf.mxu1  ;;  %v5514_v11 = vpop.f32.mrf.mxu0 }
 0x1d7   : > { %v5465_v59 = vpop.f32.mrf.mxu1 }
 0x1d9   : > { %v5467_v60 = vpop.f32.mrf.mxu1  ;;  %v5522_v12 = vpop.f32.mrf.mxu0 }
 0x1db   : > { %v5471_v29 = vpop.f32.mrf.mxu1  ;;  %v5530_v36 = vpop.f32.mrf.mxu0 }
 0x1dd   : > { %v5473_v62 = vpop.f32.mrf.mxu1  ;;  %v4464_v38 = vpop.f32.mrf.mxu0 }
 0x1df   : > { %v5477_v40 = vpop.f32.mrf.mxu1  ;;  %v1761_v22 = vpop.f32.mrf.mxu0 }
 0x1e1   : > { %v5485_v53 = vpop.f32.mrf.mxu1  ;;  %v4467_v25 = vpop.f32.mrf.mxu0 }
 0x1e3   : > { %v5492_v2 = vpop.f32.mrf.mxu1  ;;  %v1771_v49 = vpop.f32.mrf.mxu0 }
 0x1e5   : > { %v5497_v0 = vpop.f32.mrf.mxu1  ;;  %v4470_v30 = vpop.f32.mrf.mxu0 }
 0x1e7   : > { %v5504_v5 = vpop.f32.mrf.mxu1  ;;  %v1781_v52 = vpop.f32.mrf.mxu0 }
 0x1e8   : > { %v1613_v10 = vadd.f32 %v5504_v5, %v5562_v32  ;;  %v1610_v5 = vadd.f32 %v5562_v32, %v5497_v0 }
 0x1e9   : > { %v5509_v7 = vpop.f32.mrf.mxu1  ;;  %v4473_v55 = vpop.f32.mrf.mxu0 }
 0x1ea   : > { %v1821_v42 = vadd.f32 %v4467_v25, %v1613_v10 }
 0x1eb   : > { %v4411_v33 = vpop.f32.mrf.mxu1  ;;  %v1791_v3 = vpop.f32.mrf.mxu0 }
 0x1ec   : > { %v1615_v44 = vadd.f32 %v4411_v33, %v5562_v32 }
 0x1ed   : > { %v1573_v9 = vpop.f32.mrf.mxu1 }
 0x1ee   : > { %v1614_v1 = vadd.f32 %v5562_v32, %v1573_v9  ;;  %v1823_v13 = vadd.f32 %v4470_v30, %v1615_v44  ;;  %v1611_v9 = vadd.f32 %v5492_v2, %v5562_v32 }
 0x1ef   : > { %v4414_v6 = vpop.f32.mrf.mxu1 }
 0x1f0   : > { %v1617_v54 = vadd.f32 %v4414_v6, %v5562_v32  ;;  %v1612_v6 = vadd.f32 %v5562_v32, %v5509_v7  ;;  %v1822_v19 = vadd.f32 %v1781_v52, %v1614_v1  ;;  %v1609_v52 = vadd.f32 %v5477_v40, %v5562_v32 }
 0x1f1   : > { %v1583_v16 = vpop.f32.mrf.mxu1  ;;  %v1606_v1 = vadd.f32 %v5562_v32, %v5473_v62  ;;  %v1604_v62 = vadd.f32 %v5562_v32, %v5467_v60  ;;  %v1602_v60 = vadd.f32 %v5562_v32, %v5461_v48 }
 0x1f2   : > { %v1616_v37 = vadd.f32 %v5562_v32, %v1583_v16  ;;  %v1825_v46 = vadd.f32 %v4473_v55, %v1617_v54  ;;  %v1820_v30 = vadd.f32 %v1771_v49, %v1612_v6  ;;  %v1817_v40 = vadd.f32 %v5522_v12, %v1609_v52  ;;  %v2064_v52 = vld [vmem:[%s6021_s6 + $0x50] sm:$0xff] }
 0x1f3   : > { %v5532_v18 = vpop.f32.mrf.mxu1  ;;  %v1810_v48 = vadd.f32 %v5469_v61, %v1602_v60 }
 0x1f4   : > { %v1824_v14 = vadd.f32 %v1791_v3, %v1616_v37  ;;  %v1608_v37 = vadd.f32 %v5562_v32, %v5485_v53 }
 0x1f5   : > { %v5537_v20 = vpop.f32.mrf.mxu1 }
 0x1f6   : > { %v1816_v53 = vadd.f32 %v5530_v36, %v1608_v37  ;;  %v1814_v36 = vadd.f32 %v5514_v11, %v1606_v1  ;;  %v1812_v11 = vadd.f32 %v5490_v31, %v1604_v62  ;;  %v1618_v31 = vadd.f32 %v5562_v32, %v5537_v20  ;;  %v2068_v37 = vld [vmem:[%s6021_s6 + $0x70] sm:$0xff] }
 0x1f7   : > { %v5542_v23 = vpop.f32.mrf.mxu1 }
 0x1f9   : > { %v5547_v24 = vpop.f32.mrf.mxu1 }
 0x1fb   : > { %v5549_v34 = vpop.f32.mrf.mxu1 }
 0x1fd   : > { %v5551_v43 = vpop.f32.mrf.mxu1 }
 0x1ff   : > { %v5553_v45 = vpop.f32.mrf.mxu1 }
 0x201   : > { %v5555_v27 = vpop.f32.mrf.mxu1 }
 0x203   : > { %v4520_v41 = vpop.f32.mrf.mxu1 }
 0x205   : > { %v5557_v39 = vpop.f32.mrf.mxu1 }
 0x207   : > { %v4523_v50 = vpop.f32.mrf.mxu1 }
 0x209   : > { %v1969_v51 = vpop.f32.mrf.mxu1 }
 0x20b   : > { %v4526_v26 = vpop.f32.mrf.mxu1 }
 0x20c   : > { %v2029_v44 = vadd.f32 %v4526_v26, %v1821_v42  ;;  %v1607_v26 = vadd.f32 %v5471_v29, %v5562_v32  ;;  %v1605_v29 = vadd.f32 %v5465_v59, %v5562_v32  ;;  %v1603_v59 = vadd.f32 %v5459_v28, %v5562_v32  ;;  %v2056_v42 = vld [vmem:[%s6021_s6 + $0x10] sm:$0xff] }
 0x20d   : > { %v1979_v35 = vpop.f32.mrf.mxu1 }
 0x20e   : > { %v2028_v2 = vadd.f32 %v1979_v35, %v1820_v30  ;;  %v2047_v49 = vmax.f32 %v2029_v44, 0.0  ;;  %v1815_v12 = vadd.f32 %v5502_v4, %v1607_v26  ;;  %v1813_v4 = vadd.f32 %v5475_v63, %v1605_v29  ;;  %v2063_v30 = vld [vmem:[%s6021_s6 + $0x48] sm:$0xff]  ;;  %v2062_v44 = vld [vmem:[%s6021_s6 + $0x40] sm:$0xff]  ;;  %v2072_v26 = vld [vmem:[%s6021_s6 + $0x90] sm:$0xff] }
 0x20f   : > { %v4529_v57 = vpop.f32.mrf.mxu1  ;;  %v1811_v28 = vadd.f32 %v5463_v58, %v1603_v59  ;;  %v1619_v63 = vadd.f32 %v5532_v18, %v5562_v32  ;;  %v2018_v18 = vadd.f32 %v5547_v24, %v1810_v48  ;;  %v2384_v48 = vld [vmem:[%s6023_s8 + $0x10] sm:$0xff] }
 0x210   : > { %v2031_v33 = vadd.f32 %v4529_v57, %v1823_v13  ;;  %v1819_v57 = vadd.f32 %v4464_v38, %v1611_v9  ;;  %v2046_v35 = vmax.f32 %v2028_v2, 0.0  ;;  %v2057_v9 = vld [vmem:[%s6021_s6 + $0x18] sm:$0xff]  ;;  %v2066_v2 = vld [vmem:[%s6021_s6 + $0x60] sm:$0xff] }
 0x211   : > { %v1989_v47 = vpop.f32.mrf.mxu1  ;;  %v2036_v20 = vmax.f32 %v2018_v18, 0.0  ;;  %v3797_v18 = vld [vmem:[%s6023_s8 + $0x58] sm:$0xff] }
 0x212   : > { %v2030_v54 = vadd.f32 %v1989_v47, %v1822_v19  ;;  %v2049_v7 = vmax.f32 %v2031_v33, 0.0  ;;  %v1818_v47 = vadd.f32 %v1761_v22, %v1610_v5  ;;  %v2027_v0 = vadd.f32 %v4523_v50, %v1819_v57  ;;  %v2060_v5 = vld [vmem:[%s6021_s6 + $0x30] sm:$0xff]  ;;  %v2067_v57 = vld [vmem:[%s6021_s6 + $0x68] sm:$0xff] }
 0x213   : > { %v4532_v56 = vpop.f32.mrf.mxu1  ;;  %v2025_v22 = vadd.f32 %v4520_v41, %v1817_v40  ;;  %v2023_v41 = vadd.f32 %v5553_v45, %v1815_v12  ;;  %v2021_v45 = vadd.f32 %v5549_v34, %v1813_v4  ;;  %v2019_v34 = vadd.f32 %v5542_v23, %v1811_v28  ;;  %v2225_v40 = vld [vmem:[%s6022_s7 + $0x8] sm:$0xff] }
 0x214   : > { %v2033_v15 = vadd.f32 %v4532_v56, %v1825_v46  ;;  %v2048_v25 = vmax.f32 %v2030_v54, 0.0  ;;  %v2026_v38 = vadd.f32 %v1969_v51, %v1818_v47  ;;  %v2045_v50 = vmax.f32 %v2027_v0, 0.0  ;;  %v2059_v54 = vld [vmem:[%s6021_s6 + $0x28] sm:$0xff]  ;;  %v2070_v0 = vld [vmem:[%s6021_s6 + $0x80] sm:$0xff]  ;;  %4564 = vmatprep.subr.mxu1 %v2225_v40 }
 0x215   : > { %v1999_v17 = vpop.f32.mrf.mxu1  ;;  %v2024_v51 = vadd.f32 %v5557_v39, %v1816_v53  ;;  %v2043_v3 = vmax.f32 %v2025_v22, 0.0  ;;  %v2022_v39 = vadd.f32 %v5555_v27, %v1814_v36  ;;  %v2041_v10 = vmax.f32 %v2023_v41, 0.0  ;;  %v2071_v47 = vld [vmem:[%s6021_s6 + $0x88] sm:$0xff]  ;;  %4565 = vmatpush3.msra.mxu1 %v2225_v40  ;;  %v3812_v40 = vld [vmem:[%s6023_s8 + $0x80] sm:$0xff] }
 0x216   : > { %v2051_v21 = vmax.f32 %v2033_v15, 0.0  ;;  %v2032_v16 = vadd.f32 %v1999_v17, %v1824_v14  ;;  %v2044_v46 = vmax.f32 %v2026_v38, 0.0  ;;  %v2020_v27 = vadd.f32 %v5551_v43, %v1812_v11  ;;  %v4476_v14 = vpop.f32.mrf.mxu0  ;;  %v2224_v38 = vld [vmem:[%s6022_s7] sm:$0xff] }
 0x217   : > { %v2042_v56 = vmax.f32 %v2024_v51, 0.0  ;;  %v2040_v13 = vmax.f32 %v2022_v39, 0.0  ;;  %v4535_v15 = vpop.f32.mrf.mxu1  ;;  %v2039_v6 = vmax.f32 %v2021_v45, 0.0  ;;  %v1827_v58 = vadd.f32 %v4476_v14, %v1619_v63  ;;  %4566 = vmatprep.subr.mxu1 %v2224_v38  ;;  %v2387_v63 = vld [vmem:[%s6023_s8 + $0x28] sm:$0xff]  ;;  %v2385_v14 = vld [vmem:[%s6023_s8 + $0x18] sm:$0xff] }
 0x218   : > { %v2050_v55 = vmax.f32 %v2032_v16, 0.0  ;;  %2110 = vmatpush1.msra.mxu0 %v2051_v21  ;;  %v2038_v43 = vmax.f32 %v2020_v27, 0.0  ;;  %v1801_v17 = vpop.f32.mrf.mxu0  ;;  %v2037_v61 = vmax.f32 %v2019_v34, 0.0  ;;  %v2054_v16 = vld [vmem:[%s6021_s6] sm:$0xff]  ;;  %4567 = vmatpush3.msra.mxu1 %v2224_v38  ;;  %v2383_v34 = vld [vmem:[%s6023_s8 + $0x8] sm:$0xff] }
 0x219   : > { %2111 = vmatprep.subr.mxu0 %v4870_v8  ;;  %v2009_v19 = vpop.f32.mrf.mxu1  ;;  %v1826_v33 = vadd.f32 %v1801_v17, %v1618_v31  ;;  %v2035_v21 = vadd.f32 %v4535_v15, %v1827_v58  ;;  %v2386_v27 = vld [vmem:[%s6023_s8 + $0x20] sm:$0xff]  ;;  %v3800_v15 = vld [vmem:[%s6023_s8 + $0x70] sm:$0xff]  ;;  %v3799_v31 = vld [vmem:[%s6023_s8 + $0x68] sm:$0xff] }
 0x21a   : > { %2112 = vmatpush1.msra.mxu0 %v2050_v55  ;;  %v2061_v55 = vld [vmem:[%s6021_s6 + $0x38] sm:$0xff]  ;;  %v2382_v58 = vld [vmem:[%s6023_s8] sm:$0xff]  ;;  %v3795_v17 = vld [vmem:[%s6023_s8 + $0x48] sm:$0xff] }
 0x21b   : > { %2113 = vmatprep.subr.mxu0 %v4870_v8  ;;  %v2034_v23 = vadd.f32 %v2009_v19, %v1826_v33  ;;  %v2053_v32 = vmax.f32 %v2035_v21, 0.0  ;;  %v3794_v19 = vld [vmem:[%s6023_s8 + $0x40] sm:$0xff]  ;;  %v3819_v33 = vld [vmem:[%s6023_s8 + $0xb8] sm:$0xff] }
 0x21c   : > { %2114 = vmatpush1.msra.mxu0 %v2049_v7  ;;  %v2065_v7 = vld [vmem:[%s6021_s6 + $0x58] sm:$0xff] }
 0x21d   : > { %2115 = vmatprep.subr.mxu0 %v4870_v8  ;;  %v2052_v24 = vmax.f32 %v2034_v23, 0.0 }
 0x21e   : > { %2116 = vmatpush1.msra.mxu0 %v2048_v25  ;;  %v2069_v25 = vld [vmem:[%s6021_s6 + $0x78] sm:$0xff] }
 0x21f   : > { %2117 = vmatprep.subr.mxu0 %v4870_v8 }
 0x220   : > { %2118 = vmatpush1.msra.mxu0 %v2047_v49  ;;  %v2073_v49 = vld [vmem:[%s6021_s6 + $0x98] sm:$0xff] }
 0x221   : > { %2119 = vmatprep.subr.mxu0 %v4870_v8 }
 0x222   : > { %2120 = vmatpush1.msra.mxu0 %v2046_v35  ;;  %v2389_v35 = vld [vmem:[%s6023_s8 + $0x38] sm:$0xff] }
 0x223   : > { %2121 = vmatprep.subr.mxu0 %v4870_v8  ;;  %4583 = vmatprep.subr.mxu1 %v2389_v35 }
 0x224   : > { %2122 = vmatpush1.msra.mxu0 %v2045_v50  ;;  %v2388_v50 = vld [vmem:[%s6023_s8 + $0x30] sm:$0xff] }
 0x225   : > { %2123 = vmatprep.subr.mxu0 %v4870_v8 }
 0x226   : > { %2124 = vmatpush1.msra.mxu0 %v2044_v46 }
 0x227   : > { %2125 = vmatprep.subr.mxu0 %v4870_v8 }
 0x228   : > { %2126 = vmatpush1.msra.mxu0 %v2043_v3 }
 0x229   : > { %2127 = vmatprep.subr.mxu0 %v4870_v8 }
 0x22a   : > { %2128 = vmatpush1.msra.mxu0 %v2042_v56 }
 0x22b   : > { %2129 = vmatprep.subr.mxu0 %v4870_v8 }
 0x22c   : > { %2130 = vmatpush1.msra.mxu0 %v2041_v10 }
 0x22d   : > { %2131 = vmatprep.subr.mxu0 %v4870_v8 }
 0x22e   : > { %2132 = vmatpush1.msra.mxu0 %v2040_v13  ;;  %v3801_v13 = vld [vmem:[%s6023_s8 + $0x78] sm:$0xff] }
 0x22f   : > { %2133 = vmatprep.subr.mxu0 %v4870_v8 }
 0x230   : > { %2134 = vmatpush1.msra.mxu0 %v2039_v6  ;;  %v3798_v6 = vld [vmem:[%s6023_s8 + $0x60] sm:$0xff] }
 0x231   : > { %2135 = vmatprep.subr.mxu0 %v4870_v8 }
 0x232   : > { %2136 = vmatpush1.msra.mxu0 %v2038_v43  ;;  %v3796_v43 = vld [vmem:[%s6023_s8 + $0x50] sm:$0xff] }
 0x233   : > { %2137 = vmatprep.subr.mxu0 %v4870_v8 }
 0x234   : > { %2138 = vmatpush1.msra.mxu0 %v2037_v61 }
 0x235   : > { %2139 = vmatprep.subr.mxu0 %v4870_v8 }
 0x236   : > { %2140 = vmatpush1.msra.mxu0 %v2036_v20 }
 0x237   : > { %2169 = vmatprep.subr.mxu0 %v4870_v8 }
 0x238   : > { %3772 = vmatpush2.msk.msra.mxu0 %vm2105_vm2, %v2053_v32 }
 0x239   : > { %2171 = vmatprep.subr.mxu0 %v4870_v8  ;;  %v2058_v8 = vld [vmem:[%s6021_s6 + $0x20] sm:$0xff] }
 0x23a   : > { %2172 = vmatpush2.msra.mxu0 %v2052_v24 }
 0x23b   : > { %2174 = vmatmul.mubr.f32.vlgmr.msra.gmra.mxu0 %v2054_v16  ;;  %4614 = vmatprep.subr.mxu0 %v3801_v13 }
 0x23c   : > { %3774 = vmatprep.mubr.msk.f32.mxu0 %vm2074_vm1, %v2057_v9  ;;  %4615 = vmatpush3.msra.mxu0 %v3801_v13  ;;  %v3818_v9 = vld [vmem:[%s6023_s8 + $0xb0] sm:$0xff]  ;;  %v3843_v13 = vld [vmem:[%s6026_s11 + $0xe0] sm:$0xff] }
 0x23d   : > { %4616 = vmatprep.subr.mxu0 %v3800_v15 }
 0x23e   : > { %4617 = vmatpush3.msra.mxu0 %v3800_v15  ;;  %v3014_v15 = vld [vmem:[%s6026_s11 + $0x70] sm:$0xff] }
 0x23f   : > { %2179 = vmatmul.mubr.f32.gmra.mxu0 %v2056_v42  ;;  %4618 = vmatprep.subr.mxu0 %v3799_v31  ;;  %v3817_v42 = vld [vmem:[%s6023_s8 + $0xa8] sm:$0xff] }
 0x240   : > { %3775 = vmatprep.mubr.msk.f32.mxu0 %vm2074_vm1, %v2059_v54  ;;  %4619 = vmatpush3.msra.mxu0 %v3799_v31  ;;  %v3816_v54 = vld [vmem:[%s6023_s8 + $0xa0] sm:$0xff]  ;;  %v3013_v31 = vld [vmem:[%s6026_s11 + $0x68] sm:$0xff] }
 0x241   : > { %4620 = vmatprep.subr.mxu0 %v3798_v6 }
 0x242   : > { %4621 = vmatpush3.msra.mxu0 %v3798_v6  ;;  %v3840_v6 = vld [vmem:[%s6026_s11 + $0xc8] sm:$0xff] }
 0x243   : > { %2184 = vmatmul.mubr.f32.gmra.mxu0 %v2058_v8  ;;  %4622 = vmatprep.subr.mxu0 %v3797_v18 }
 0x244   : > { %3776 = vmatprep.mubr.msk.f32.mxu0 %vm2074_vm1, %v2061_v55  ;;  %4623 = vmatpush3.msra.mxu0 %v3797_v18  ;;  %v3839_v18 = vld [vmem:[%s6026_s11 + $0xc0] sm:$0xff] }
 0x245   : > { %4624 = vmatprep.subr.mxu0 %v3796_v43 }
 0x246   : > { %4625 = vmatpush3.msra.mxu0 %v3796_v43  ;;  %v3838_v43 = vld [vmem:[%s6026_s11 + $0xb8] sm:$0xff] }
 0x247   : > { %2189 = vmatmul.mubr.f32.gmra.mxu0 %v2060_v5  ;;  %4626 = vmatprep.subr.mxu0 %v3795_v17 }
 0x248   : > { %3777 = vmatprep.mubr.msk.f32.mxu0 %vm2074_vm1, %v2063_v30  ;;  %4627 = vmatpush3.msra.mxu0 %v3795_v17  ;;  %v3010_v17 = vld [vmem:[%s6026_s11 + $0x50] sm:$0xff] }
 0x249   : > { %4628 = vmatprep.subr.mxu0 %v3794_v19 }
 0x24a   : > { %4629 = vmatpush3.msra.mxu0 %v3794_v19  ;;  %v3837_v19 = vld [vmem:[%s6026_s11 + $0xb0] sm:$0xff] }
 0x24b   : > { %2194 = vmatmul.mubr.f32.gmra.mxu0 %v2062_v44 }
 0x24c   : > { %3778 = vmatprep.mubr.msk.f32.mxu0 %vm2074_vm1, %v2065_v7 }
 0x24f   : > { %2199 = vmatmul.mubr.f32.gmra.mxu0 %v2064_v52  ;;  %v3815_v52 = vld [vmem:[%s6023_s8 + $0x98] sm:$0xff] }
 0x250   : > { %3779 = vmatprep.mubr.msk.f32.mxu0 %vm2074_vm1, %v2067_v57  ;;  %v3814_v57 = vld [vmem:[%s6023_s8 + $0x90] sm:$0xff] }
 0x253   : > { %2204 = vmatmul.mubr.f32.gmra.mxu0 %v2066_v2  ;;  %v3813_v2 = vld [vmem:[%s6023_s8 + $0x88] sm:$0xff] }
 0x254   : > { %3780 = vmatprep.mubr.msk.f32.mxu0 %vm2074_vm1, %v2069_v25 }
 0x257   : > { %2209 = vmatmul.mubr.f32.gmra.mxu0 %v2068_v37 }
 0x258   : > { %3781 = vmatprep.mubr.msk.f32.mxu0 %vm2074_vm1, %v2071_v47 }
 0x25b   : > { %2214 = vmatmul.mubr.f32.gmra.mxu0 %v2070_v0 }
 0x25c   : > { %3782 = vmatprep.mubr.msk.f32.mxu0 %vm2074_vm1, %v2073_v49 }
 0x25f   : > { %2219 = vmatmul.mubr.f32.gmra.mxu0 %v2072_v26 }
 0x2fb   : > { %v2175_v1 = vpop.f32.mrf.mxu0 }
 0x2fc   : > { %4568 = vmatprep.mubr.f32.mxu1 %v2175_v1 }
 0x2fd   : > { %v2177_v53 = vpop.f32.mrf.mxu0 }
 0x2ff   : > { %v2180_v22 = vpop.f32.mrf.mxu0 }
 0x300   : > { %4569 = vmatmul.mubr.f32.vlgmr.msra.gmra.mxu1 %v2180_v22 }
 0x301   : > { %v2182_v29 = vpop.f32.mrf.mxu0  ;;  %4584 = vmatpush3.msra.mxu1 %v2389_v35 }
 0x302   : > { %4585 = vmatprep.subr.mxu1 %v2388_v50 }
 0x303   : > { %v2185_v12 = vpop.f32.mrf.mxu0  ;;  %4586 = vmatpush3.msra.mxu1 %v2388_v50 }
 0x304   : > { %4571 = vmatprep.mubr.f32.mxu1 %v2185_v12  ;;  %4587 = vmatprep.subr.mxu1 %v2387_v63 }
 0x305   : > { %v2187_v51 = vpop.f32.mrf.mxu0  ;;  %4588 = vmatpush3.msra.mxu1 %v2387_v63  ;;  %v3015_v63 = vld [vmem:[%s6026_s11 + $0x78] sm:$0xff] }
 0x306   : > { %4589 = vmatprep.subr.mxu1 %v2386_v27  ;;  %4676 = vmatprep.subr.mxu0 %v3015_v63 }
 0x307   : > { %v2190_v46 = vpop.f32.mrf.mxu0  ;;  %4590 = vmatpush3.msra.mxu1 %v2386_v27  ;;  %v3844_v27 = vld [vmem:[%s6026_s11 + $0xe8] sm:$0xff] }
 0x308   : > { %4572 = vmatmul.mubr.f32.gmra.mxu1 %v2190_v46  ;;  %4591 = vmatprep.subr.mxu1 %v2385_v14 }
 0x309   : > { %v2192_v62 = vpop.f32.mrf.mxu0  ;;  %4592 = vmatpush3.msra.mxu1 %v2385_v14  ;;  %v3842_v14 = vld [vmem:[%s6026_s11 + $0xd8] sm:$0xff] }
 0x30a   : > { %4593 = vmatprep.subr.mxu1 %v2384_v48 }
 0x30b   : > { %v2195_v36 = vpop.f32.mrf.mxu0  ;;  %4594 = vmatpush3.msra.mxu1 %v2384_v48  ;;  %v3841_v48 = vld [vmem:[%s6026_s11 + $0xd0] sm:$0xff] }
 0x30c   : > { %4574 = vmatprep.mubr.f32.mxu1 %v2195_v36  ;;  %4595 = vmatprep.subr.mxu1 %v2383_v34 }
 0x30d   : > { %v2197_v41 = vpop.f32.mrf.mxu0  ;;  %4596 = vmatpush3.msra.mxu1 %v2383_v34  ;;  %v3012_v34 = vld [vmem:[%s6026_s11 + $0x60] sm:$0xff] }
 0x30e   : > { %4597 = vmatprep.subr.mxu1 %v2382_v58 }
 0x30f   : > { %v2200_v3 = vpop.f32.mrf.mxu0  ;;  %4598 = vmatpush3.msra.mxu1 %v2382_v58  ;;  %v3011_v58 = vld [vmem:[%s6026_s11 + $0x58] sm:$0xff] }
 0x310   : > { %4575 = vmatmul.mubr.f32.gmra.mxu1 %v2200_v3  ;;  %4645 = vmatprep.subr.mxu1 %v3819_v33 }
 0x311   : > { %v2202_v59 = vpop.f32.mrf.mxu0 }
 0x313   : > { %v2205_v4 = vpop.f32.mrf.mxu0 }
 0x314   : > { %4577 = vmatprep.mubr.f32.mxu1 %v2205_v4 }
 0x315   : > { %v2207_v39 = vpop.f32.mrf.mxu0 }
 0x317   : > { %v2210_v56 = vpop.f32.mrf.mxu0 }
 0x318   : > { %4578 = vmatmul.mubr.f32.gmra.mxu1 %v2210_v56 }
 0x319   : > { %v2212_v60 = vpop.f32.mrf.mxu0 }
 0x31b   : > { %v2215_v11 = vpop.f32.mrf.mxu0 }
 0x31c   : > { %4580 = vmatprep.mubr.f32.mxu1 %v2215_v11 }
 0x31d   : > { %v2217_v45 = vpop.f32.mrf.mxu0 }
 0x31f   : > { %v2220_v10 = vpop.f32.mrf.mxu0 }
 0x320   : > { %4581 = vmatmul.mubr.f32.gmra.mxu1 %v2220_v10  ;;  %v3846_v10 = vld [vmem:[%s6026_s11 + $0xf8] sm:$0xff] }
 0x321   : > { %v2222_v28 = vpop.f32.mrf.mxu0 }
 0x322   : > { %v3845_v28 = vld [vmem:[%s6026_s11 + $0xf0] sm:$0xff] }
 0x3c0   : > { %v4570_v61 = vpop.f32.mrf.mxu1 }
 0x3c1   : > { %2356 = vst.msk [vmem:[#allocation3 + $0x8] sm:$0xff] %vm508_vm0, %v4570_v61  ;;  %v3836_v61 = vld [vmem:[%s6026_s11 + $0xa8] sm:$0xff] }
 0x3c2   : > { %v2306_v21 = vpop.f32.mrf.mxu1 }
 0x3c3   : > { %2355 = vst.msk [vmem:[#allocation3] sm:$0xff] %vm508_vm0, %v2306_v21  ;;  %v3008_v21 = vld [vmem:[%s6026_s11 + $0x40] sm:$0xff] }
 0x3c8   : > { %v4573_v20 = vpop.f32.mrf.mxu1  ;;  %v2373_v16 = vld [vmem:[#allocation3 + $0x8] sm:$0xff] }
 0x3c9   : > { %2358 = vst.msk [vmem:[#allocation3 + $0x18] sm:$0xff] %vm508_vm0, %v4573_v20  ;;  %v3835_v20 = vld [vmem:[%s6026_s11 + $0xa0] sm:$0xff] }
 0x3ca   : > { %v2316_v23 = vpop.f32.mrf.mxu1  ;;  %v2372_v32 = vld [vmem:[#allocation3] sm:$0xff] }
 0x3cb   : > { %v2545_v24 = vld [vmem:[#allocation3 + $0x1] sm:$0xff]  ;;  %2357 = vst.msk [vmem:[#allocation3 + $0x10] sm:$0xff] %vm508_vm0, %v2316_v23  ;;  %4599 = vmatprep.mubr.msk.f32.mxu1 %vm508_vm0, %v2372_v32 }
 0x3cc   : > { %4630 = vmatprep.mubr.msk.f32.mxu0 %vm508_vm0, %v2545_v24  ;;  %4600 = vmatmul.mubr.msk.f32.vlgmr.msra.gmra.mxu1 %vm508_vm0, %v2373_v16  ;;  %v2719_v62 = vld [vmem:[#allocation3 + $0x2] sm:$0xff] }
 0x3cd   : > { %4646 = vmatpush3.msra.mxu1 %v3819_v33  ;;  %v3009_v33 = vld [vmem:[%s6026_s11 + $0x48] sm:$0xff]  ;;  %v3007_v23 = vld [vmem:[%s6026_s11 + $0x38] sm:$0xff]  ;;  %v3006_v24 = vld [vmem:[%s6026_s11 + $0x30] sm:$0xff] }
 0x3ce   : > { %4647 = vmatprep.subr.mxu1 %v3818_v9  ;;  %v3834_v32 = vld [vmem:[%s6026_s11 + $0x98] sm:$0xff]  ;;  %v3833_v16 = vld [vmem:[%s6026_s11 + $0x90] sm:$0xff] }
 0x3cf   : > { %4648 = vmatpush3.msra.mxu1 %v3818_v9  ;;  %v3005_v9 = vld [vmem:[%s6026_s11 + $0x28] sm:$0xff] }
 0x3d0   : > { %v4576_v8 = vpop.f32.mrf.mxu1  ;;  %4649 = vmatprep.subr.mxu1 %v3817_v42  ;;  %v2375_v7 = vld [vmem:[#allocation3 + $0x18] sm:$0xff] }
 0x3d1   : > { %2360 = vst.msk [vmem:[#allocation3 + $0x28] sm:$0xff] %vm508_vm0, %v4576_v8  ;;  %4650 = vmatpush3.msra.mxu1 %v3817_v42  ;;  %v3832_v42 = vld [vmem:[%s6026_s11 + $0x88] sm:$0xff]  ;;  %v3831_v8 = vld [vmem:[%s6026_s11 + $0x80] sm:$0xff] }
 0x3d2   : > { %v2326_v55 = vpop.f32.mrf.mxu1  ;;  %v2374_v5 = vld [vmem:[#allocation3 + $0x10] sm:$0xff]  ;;  %4651 = vmatprep.subr.mxu1 %v3816_v54 }
 0x3d3   : > { %v2546_v30 = vld [vmem:[#allocation3 + $0x9] sm:$0xff]  ;;  %v2547_v44 = vld [vmem:[#allocation3 + $0x11] sm:$0xff]  ;;  %2359 = vst.msk [vmem:[#allocation3 + $0x20] sm:$0xff] %vm508_vm0, %v2326_v55  ;;  %4602 = vmatprep.mubr.msk.f32.mxu1 %vm508_vm0, %v2374_v5  ;;  %4652 = vmatpush3.msra.mxu1 %v3816_v54  ;;  %v3002_v5 = vld [vmem:[%s6026_s11 + $0x10] sm:$0xff] }
 0x3d4   : > { %4631 = vmatmul.mubr.msk.f32.vlgmr.msra.gmra.mxu0 %vm508_vm0, %v2546_v30  ;;  %4603 = vmatmul.mubr.msk.f32.gmra.mxu1 %vm508_vm0, %v2375_v7  ;;  %v2720_v41 = vld [vmem:[#allocation3 + $0xa] sm:$0xff]  ;;  %v2721_v3 = vld [vmem:[#allocation3 + $0x12] sm:$0xff] }
 0x3d5   : > { %4633 = vmatprep.mubr.msk.f32.mxu0 %vm508_vm0, %v2547_v44  ;;  %4653 = vmatprep.subr.mxu1 %v3815_v52  ;;  %v3004_v54 = vld [vmem:[%s6026_s11 + $0x20] sm:$0xff]  ;;  %v3003_v55 = vld [vmem:[%s6026_s11 + $0x18] sm:$0xff]  ;;  %v3001_v30 = vld [vmem:[%s6026_s11 + $0x8] sm:$0xff] }
 0x3d6   : > { %4654 = vmatpush3.msra.mxu1 %v3815_v52  ;;  %4677 = vmatpush3.msra.mxu0 %v3015_v63  ;;  %v3000_v44 = vld [vmem:[%s6026_s11] sm:$0xff]  ;;  %v5912_v7 = vld [vmem:[%s6026_s11 + $0x178] sm:$0xff] }
 0x3d7   : > { %4655 = vmatprep.subr.mxu1 %v3814_v57  ;;  %4678 = vmatprep.subr.mxu0 %v3014_v15 }
 0x3d8   : > { %v4579_v25 = vpop.f32.mrf.mxu1  ;;  %4656 = vmatpush3.msra.mxu1 %v3814_v57  ;;  %v2377_v26 = vld [vmem:[#allocation3 + $0x28] sm:$0xff]  ;;  %4679 = vmatpush3.msra.mxu0 %v3014_v15 }
 0x3d9   : > { %2362 = vst.msk [vmem:[#allocation3 + $0x38] sm:$0xff] %vm508_vm0, %v4579_v25  ;;  %4657 = vmatprep.subr.mxu1 %v3813_v2  ;;  %4680 = vmatprep.subr.mxu0 %v3013_v31 }
 0x3da   : > { %v2336_v37 = vpop.f32.mrf.mxu1  ;;  %v2376_v47 = vld [vmem:[#allocation3 + $0x20] sm:$0xff]  ;;  %4658 = vmatpush3.msra.mxu1 %v3813_v2  ;;  %4681 = vmatpush3.msra.mxu0 %v3013_v31 }
 0x3db   : > { %v2548_v0 = vld [vmem:[#allocation3 + $0x19] sm:$0xff]  ;;  %v2549_v49 = vld [vmem:[#allocation3 + $0x21] sm:$0xff]  ;;  %2361 = vst.msk [vmem:[#allocation3 + $0x30] sm:$0xff] %vm508_vm0, %v2336_v37  ;;  %4605 = vmatprep.mubr.msk.f32.mxu1 %vm508_vm0, %v2376_v47  ;;  %4659 = vmatprep.subr.mxu1 %v3812_v40 }
 0x3dc   : > { %4634 = vmatmul.mubr.msk.f32.gmra.mxu0 %vm508_vm0, %v2548_v0  ;;  %4606 = vmatmul.mubr.msk.f32.gmra.mxu1 %vm508_vm0, %v2377_v26  ;;  %v2722_v59 = vld [vmem:[#allocation3 + $0x1a] sm:$0xff]  ;;  %v2723_v4 = vld [vmem:[#allocation3 + $0x22] sm:$0xff] }
 0x3dd   : > { %4636 = vmatprep.mubr.msk.f32.mxu0 %vm508_vm0, %v2549_v49  ;;  %4660 = vmatpush3.msra.mxu1 %v3812_v40 }
 0x3de   : > { %4723 = vmatprep.subr.mxu1 %v3846_v10  ;;  %4682 = vmatprep.subr.mxu0 %v3012_v34 }
 0x3df   : > { %4683 = vmatpush3.msra.mxu0 %v3012_v34 }
 0x3e0   : > { %v4582_v38 = vpop.f32.mrf.mxu1  ;;  %v2379_v50 = vld [vmem:[#allocation3 + $0x38] sm:$0xff]  ;;  %4684 = vmatprep.subr.mxu0 %v3011_v58 }
 0x3e1   : > { %2364 = vst.msk [vmem:[#allocation3 + $0x48] sm:$0xff] %vm508_vm0, %v4582_v38  ;;  %4685 = vmatpush3.msra.mxu0 %v3011_v58  ;;  %v3783_v38 = vld [vmem:[%s6024_s9] ss:$0 sm:$0xff] }
 0x3e2   : > { %v2346_v35 = vpop.f32.mrf.mxu1  ;;  %v2378_v1 = vld [vmem:[#allocation3 + $0x30] sm:$0xff]  ;;  %4686 = vmatprep.subr.mxu0 %v3010_v17 }
 0x3e3   : > { %v2550_v53 = vld [vmem:[#allocation3 + $0x29] sm:$0xff]  ;;  %v2551_v22 = vld [vmem:[#allocation3 + $0x31] sm:$0xff]  ;;  %2363 = vst.msk [vmem:[#allocation3 + $0x40] sm:$0xff] %vm508_vm0, %v2346_v35  ;;  %4608 = vmatprep.mubr.msk.f32.mxu1 %vm508_vm0, %v2378_v1  ;;  %4687 = vmatpush3.msra.mxu0 %v3010_v17 }
 0x3e4   : > { %4637 = vmatmul.mubr.msk.f32.gmra.mxu0 %vm508_vm0, %v2550_v53  ;;  %4609 = vmatmul.mubr.msk.f32.gmra.mxu1 %vm508_vm0, %v2379_v50  ;;  %v2724_v39 = vld [vmem:[#allocation3 + $0x2a] sm:$0xff]  ;;  %v2725_v56 = vld [vmem:[#allocation3 + $0x32] sm:$0xff]  ;;  %v2921_v53 = vpop.permute.xlu1 %2920 }
 0x3e5   : > { %4639 = vmatprep.mubr.msk.f32.mxu0 %vm508_vm0, %v2551_v22  ;;  %4688 = vmatprep.subr.mxu0 %v3009_v33 }
 0x3e6   : > { %4689 = vmatpush3.msra.mxu0 %v3009_v33 }
 0x3e7   : > { %4690 = vmatprep.subr.mxu0 %v3008_v21 }
 0x3e8   : > { %v2381_v46 = vld [vmem:[#allocation3 + $0x48] sm:$0x3f]  ;;  %4691 = vmatpush3.msra.mxu0 %v3008_v21 }
 0x3e9   : > { %v2554_v36 = vld [vmem:[#allocation3 + $0x49] sm:$0x3f]  ;;  %4692 = vmatprep.subr.mxu0 %v3007_v23 }
 0x3ea   : > { %v2380_v29 = vld [vmem:[#allocation3 + $0x40] sm:$0xff]  ;;  %v2728_v45 = vld [vmem:[#allocation3 + $0x4a] sm:$0x3f]  ;;  %4693 = vmatpush3.msra.mxu0 %v3007_v23 }
 0x3eb   : > { %v2552_v12 = vld [vmem:[#allocation3 + $0x39] sm:$0xff]  ;;  %v2553_v51 = vld [vmem:[#allocation3 + $0x41] sm:$0xff]  ;;  %4611 = vmatprep.mubr.msk.f32.mxu1 %vm508_vm0, %v2380_v29  ;;  %4694 = vmatprep.subr.mxu0 %v3006_v24  ;;  %v2916_v29 = vpop.permute.xlu0 %2915 }
 0x3ec   : > { %4640 = vmatmul.mubr.msk.f32.gmra.mxu0 %vm508_vm0, %v2552_v12  ;;  %4612 = vmatmul.mubr.msk.f32.gmra.mxu1 %vm508_vm0, %v2381_v46  ;;  %v2726_v60 = vld [vmem:[#allocation3 + $0x3a] sm:$0xff]  ;;  %v2727_v11 = vld [vmem:[#allocation3 + $0x42] sm:$0xff] }
 0x3ed   : > { %4642 = vmatprep.mubr.msk.f32.mxu0 %vm508_vm0, %v2553_v51  ;;  %4661 = vmatprep.mubr.msk.f32.mxu1 %vm508_vm0, %v2719_v62 }
 0x3ee   : > { %4695 = vmatpush3.msra.mxu0 %v3006_v24 }
 0x3ef   : > { %4696 = vmatprep.subr.mxu0 %v3005_v9 }
 0x3f0   : > { %4643 = vmatmul.mubr.msk.f32.gmra.mxu0 %vm508_vm0, %v2554_v36  ;;  %4662 = vmatmul.mubr.msk.f32.vlgmr.msra.gmra.mxu1 %vm508_vm0, %v2720_v41 }
 0x3f1   : > { %4664 = vmatprep.mubr.msk.f32.mxu1 %vm508_vm0, %v2721_v3  ;;  %4724 = vmatpush3.msra.mxu1 %v3846_v10  ;;  %v2931_v3 = vpop.permute.xlu1 %2930 }
 0x3f2   : > { %4725 = vmatprep.subr.mxu1 %v3845_v28  ;;  %4697 = vmatpush3.msra.mxu0 %v3005_v9 }
 0x3f3   : > { %4726 = vmatpush3.msra.mxu1 %v3845_v28  ;;  %4698 = vmatprep.subr.mxu0 %v3004_v54 }
 0x3f4   : > { %4665 = vmatmul.mubr.msk.f32.gmra.mxu1 %vm508_vm0, %v2722_v59  ;;  %4727 = vmatprep.subr.mxu1 %v3844_v27 }
 0x3f5   : > { %4667 = vmatprep.mubr.msk.f32.mxu1 %vm508_vm0, %v2723_v4  ;;  %4728 = vmatpush3.msra.mxu1 %v3844_v27 }
 0x3f6   : > { %4729 = vmatprep.subr.mxu1 %v3843_v13  ;;  %4699 = vmatpush3.msra.mxu0 %v3004_v54 }
 0x3f7   : > { %4730 = vmatpush3.msra.mxu1 %v3843_v13  ;;  %4700 = vmatprep.subr.mxu0 %v3003_v55 }
 0x3f8   : > { %4668 = vmatmul.mubr.msk.f32.gmra.mxu1 %vm508_vm0, %v2724_v39  ;;  %4731 = vmatprep.subr.mxu1 %v3842_v14 }
 0x3f9   : > { %4670 = vmatprep.mubr.msk.f32.mxu1 %vm508_vm0, %v2725_v56  ;;  %4732 = vmatpush3.msra.mxu1 %v3842_v14 }
 0x3fa   : > { %4733 = vmatprep.subr.mxu1 %v3841_v48  ;;  %4701 = vmatpush3.msra.mxu0 %v3003_v55 }
 0x3fb   : > { %4734 = vmatpush3.msra.mxu1 %v3841_v48  ;;  %4702 = vmatprep.subr.mxu0 %v3002_v5 }
 0x3fc   : > { %4671 = vmatmul.mubr.msk.f32.gmra.mxu1 %vm508_vm0, %v2726_v60  ;;  %4735 = vmatprep.subr.mxu1 %v3840_v6 }
 0x3fd   : > { %4673 = vmatprep.mubr.msk.f32.mxu1 %vm508_vm0, %v2727_v11  ;;  %4736 = vmatpush3.msra.mxu1 %v3840_v6  ;;  %v2926_v11 = vpop.permute.xlu0 %2925 }
 0x3fe   : > { %4737 = vmatprep.subr.mxu1 %v3839_v18  ;;  %4703 = vmatpush3.msra.mxu0 %v3002_v5 }
 0x3ff   : > { %4738 = vmatpush3.msra.mxu1 %v3839_v18  ;;  %4704 = vmatprep.subr.mxu0 %v3001_v30  ;;  %v2941_v18 = vpop.permute.xlu1 %2940 }
 0x400   : > { %4674 = vmatmul.mubr.msk.f32.gmra.mxu1 %vm508_vm0, %v2728_v45  ;;  %4739 = vmatprep.subr.mxu1 %v3838_v43 }
 0x401   : > { %4740 = vmatpush3.msra.mxu1 %v3838_v43  ;;  %4705 = vmatpush3.msra.mxu0 %v3001_v30 }
 0x402   : > { %4741 = vmatprep.subr.mxu1 %v3837_v19  ;;  %4706 = vmatprep.subr.mxu0 %v3000_v44 }
 0x403   : > { %4742 = vmatpush3.msra.mxu1 %v3837_v19  ;;  %4707 = vmatpush3.msra.mxu0 %v3000_v44 }
 0x404   : > { %4743 = vmatprep.subr.mxu1 %v3836_v61  ;;  %4770 = vmatprep.subr.mxu0 %v5912_v7 }
 0x405   : > { %4744 = vmatpush3.msra.mxu1 %v3836_v61 }
 0x406   : > { %4745 = vmatprep.subr.mxu1 %v3835_v20 }
 0x407   : > { %4746 = vmatpush3.msra.mxu1 %v3835_v20  ;;  %v2936_v20 = vpop.permute.xlu0 %2935 }
 0x408   : > { %4747 = vmatprep.subr.mxu1 %v3834_v32 }
 0x409   : > { %4748 = vmatpush3.msra.mxu1 %v3834_v32 }
 0x40a   : > { %4749 = vmatprep.subr.mxu1 %v3833_v16 }
 0x40b   : > { %4750 = vmatpush3.msra.mxu1 %v3833_v16 }
 0x40c   : > { %4751 = vmatprep.subr.mxu1 %v3832_v42 }
 0x40d   : > { %4752 = vmatpush3.msra.mxu1 %v3832_v42 }
 0x40e   : > { %4753 = vmatprep.subr.mxu1 %v3831_v8 }
 0x40f   : > { %4754 = vmatpush3.msra.mxu1 %v3831_v8 }
 0x48c   : > { %v4601_v52 = vpop.f32.mrf.mxu1 }
 0x48d   : > { %v2536_v12 = vadd.f32 %v4601_v52, %v3783_v38 }
 0x48e   : > { %v2486_v57 = vpop.f32.mrf.mxu1 }
 0x48f   : > { %v2535_v46 = vadd.f32 %v3783_v38, %v2486_v57 }
 0x494   : > { %v4604_v2 = vpop.f32.mrf.mxu1  ;;  %v4632_v37 = vpop.f32.mrf.mxu0 }
 0x495   : > { %v2710_v62 = vadd.f32 %v4632_v37, %v2536_v12  ;;  %v2538_v59 = vadd.f32 %v4604_v2, %v3783_v38  ;;  %v2951_v2 = vpop.permute.xlu1 %2950 }
 0x496   : > { %v2496_v25 = vpop.f32.mrf.mxu1  ;;  %v2660_v0 = vpop.f32.mrf.mxu0 }
 0x497   : > { %v2709_v4 = vadd.f32 %v2660_v0, %v2535_v46  ;;  %v2537_v45 = vadd.f32 %v3783_v38, %v2496_v25 }
 0x49c   : > { %v4607_v47 = vpop.f32.mrf.mxu1  ;;  %v4635_v26 = vpop.f32.mrf.mxu0 }
 0x49d   : > { %v2712_v10 = vadd.f32 %v4635_v26, %v2538_v59  ;;  %v2540_v27 = vadd.f32 %v4607_v47, %v3783_v38 }
 0x49e   : > { %v2506_v49 = vpop.f32.mrf.mxu1  ;;  %v2670_v35 = vpop.f32.mrf.mxu0 }
 0x49f   : > { %v2711_v14 = vadd.f32 %v2670_v35, %v2537_v45  ;;  %v2539_v34 = vadd.f32 %v3783_v38, %v2506_v49 }
 0x4a4   : > { %v4610_v40 = vpop.f32.mrf.mxu1  ;;  %v4638_v22 = vpop.f32.mrf.mxu0 }
 0x4a5   : > { %v2714_v43 = vadd.f32 %v4638_v22, %v2540_v27  ;;  %v2542_v61 = vadd.f32 %v4610_v40, %v3783_v38  ;;  %v2946_v22 = vpop.permute.xlu0 %2945  ;;  %v3858_v27 = vld [vmem:[%s6026_s11 + $0x158] sm:$0xff] }
 0x4a6   : > { %v2516_v1 = vpop.f32.mrf.mxu1  ;;  %v2680_v36 = vpop.f32.mrf.mxu0 }
 0x4a7   : > { %v2713_v23 = vadd.f32 %v2680_v36, %v2539_v34  ;;  %v2541_v9 = vadd.f32 %v3783_v38, %v2516_v1  ;;  %v3861_v36 = vld [vmem:[%s6026_s11 + $0x170] sm:$0xff] }
 0x4ac   : > { %v4613_v50 = vpop.f32.mrf.mxu1  ;;  %v4641_v56 = vpop.f32.mrf.mxu0 }
 0x4ad   : > { %v2716_v42 = vadd.f32 %v4641_v56, %v2542_v61  ;;  %v2544_v55 = vadd.f32 %v4613_v50, %v3783_v38  ;;  %v2961_v56 = vpop.permute.xlu1 %2960  ;;  %v3852_v61 = vld [vmem:[%s6026_s11 + $0x128] sm:$0xff] }
 0x4ae   : > { %v2526_v51 = vpop.f32.mrf.mxu1  ;;  %v2690_v6 = vpop.f32.mrf.mxu0 }
 0x4af   : > { %v2715_v52 = vadd.f32 %v2690_v6, %v2541_v9  ;;  %v2543_v25 = vadd.f32 %v3783_v38, %v2526_v51  ;;  %v3855_v6 = vld [vmem:[%s6026_s11 + $0x140] sm:$0xff] }
 0x4b0   : > { %v4663_v41 = vpop.f32.mrf.mxu1  ;;  %v4644_v54 = vpop.f32.mrf.mxu0 }
 0x4b1   : > { %v2884_v39 = vadd.f32 %v4663_v41, %v2710_v62  ;;  %v2718_v40 = vadd.f32 %v4644_v54, %v2544_v55 }
 0x4b2   : > { %v2834_v60 = vpop.f32.mrf.mxu1  ;;  %v2700_v49 = vpop.f32.mrf.mxu0 }
 0x4b3   : > { %v2894_v28 = vmax.f32 %v2884_v39, 0.0  ;;  %v2883_v63 = vadd.f32 %v2834_v60, %v2709_v4  ;;  %v2717_v46 = vadd.f32 %v2700_v49, %v2543_v25  ;;  %v3860_v39 = vld [vmem:[%s6026_s11 + $0x168] sm:$0xff] }
 0x4b4   : > { %v4666_v13 = vpop.f32.mrf.mxu1 }
 0x4b5   : > { %v2964_v15 = vmul.f32 %v2921_v53, %v2894_v28  ;;  %v2893_v48 = vmax.f32 %v2883_v63, 0.0  ;;  %v2886_v31 = vadd.f32 %v4666_v13, %v2712_v10  ;;  %v3859_v28 = vld [vmem:[%s6026_s11 + $0x160] sm:$0xff]  ;;  %v2956_v63 = vpop.permute.xlu0 %2955 }
 0x4b6   : > { %v2844_v58 = vpop.f32.mrf.mxu1 }
 0x4b7   : > { %2974 = vst [vmem:[#allocation4 + $0x9] sm:$0xff] %v2964_v15  ;;  %v2963_v17 = vmul.f32 %v2916_v29, %v2893_v48  ;;  %v2896_v19 = vmax.f32 %v2886_v31, 0.0  ;;  %v2885_v33 = vadd.f32 %v2844_v58, %v2711_v14  ;;  %v3856_v48 = vld [vmem:[%s6026_s11 + $0x148] sm:$0xff] }
 0x4b8   : > { %v4669_v21 = vpop.f32.mrf.mxu1 }
 0x4b9   : > { %2973 = vst [vmem:[#allocation4 + $0x1] sm:$0xff] %v2963_v17  ;;  %v2966_v32 = vmul.f32 %v2931_v3, %v2896_v19  ;;  %v2895_v24 = vmax.f32 %v2885_v33, 0.0  ;;  %v2888_v16 = vadd.f32 %v4669_v21, %v2714_v43  ;;  %4755 = vmatprep.mubr.f32.mxu1 %v2963_v17  ;;  %v3853_v19 = vld [vmem:[%s6026_s11 + $0x130] sm:$0xff]  ;;  %v3851_v21 = vld [vmem:[%s6026_s11 + $0x120] sm:$0xff] }
 0x4ba   : > { %v2854_v8 = vpop.f32.mrf.mxu1  ;;  %4756 = vmatmul.mubr.f32.vlgmr.msra.gmra.mxu1 %v2964_v15  ;;  %v3857_v15 = vld [vmem:[%s6026_s11 + $0x150] sm:$0xff] }
 0x4bb   : > { %2976 = vst [vmem:[#allocation4 + $0x19] sm:$0xff] %v2966_v32  ;;  %v2965_v5 = vmul.f32 %v2926_v11, %v2895_v24  ;;  %v2898_v30 = vmax.f32 %v2888_v16, 0.0  ;;  %v2887_v44 = vadd.f32 %v2854_v8, %v2713_v23  ;;  %v3849_v23 = vld [vmem:[%s6026_s11 + $0x110] sm:$0xff]  ;;  %v3847_v24 = vld [vmem:[%s6026_s11 + $0x100] sm:$0xff] }
 0x4bc   : > { %v4672_v57 = vpop.f32.mrf.mxu1 }
 0x4bd   : > { %2975 = vst [vmem:[#allocation4 + $0x11] sm:$0xff] %v2965_v5  ;;  %v2968_v37 = vmul.f32 %v2941_v18, %v2898_v30  ;;  %v2897_v47 = vmax.f32 %v2887_v44, 0.0  ;;  %v2890_v0 = vadd.f32 %v4672_v57, %v2716_v42  ;;  %4758 = vmatprep.mubr.f32.mxu1 %v2965_v5  ;;  %v3854_v18 = vld [vmem:[%s6026_s11 + $0x138] sm:$0xff] }
 0x4be   : > { %v2864_v26 = vpop.f32.mrf.mxu1  ;;  %4759 = vmatmul.mubr.f32.gmra.mxu1 %v2966_v32  ;;  %v3848_v32 = vld [vmem:[%s6026_s11 + $0x108] sm:$0xff] }
 0x4bf   : > { %2978 = vst [vmem:[#allocation4 + $0x29] sm:$0xff] %v2968_v37  ;;  %v2967_v35 = vmul.f32 %v2936_v20, %v2897_v47  ;;  %v2900_v1 = vmax.f32 %v2890_v0, 0.0  ;;  %v2889_v53 = vadd.f32 %v2864_v26, %v2715_v52  ;;  %v3850_v20 = vld [vmem:[%s6026_s11 + $0x118] sm:$0xff]  ;;  %v3455_v52 = vld [vmem:[%s6028_s13] sm:$0xff] }
 0x4c0   : > { %v4675_v50 = vpop.f32.mrf.mxu1  ;;  %v2990_v29 = vld [vmem:[#allocation4] sm:$0xff]  ;;  %v2991_v12 = vld [vmem:[#allocation4 + $0x8] sm:$0xff] }
 0x4c1   : > { %2977 = vst [vmem:[#allocation4 + $0x21] sm:$0xff] %v2967_v35  ;;  %v2970_v38 = vmul.f32 %v2951_v2, %v2900_v1  ;;  %v2899_v51 = vmax.f32 %v2889_v53, 0.0  ;;  %v2892_v62 = vadd.f32 %v4675_v50, %v2718_v40  ;;  %4708 = vmatprep.mubr.f32.mxu0 %v2990_v29  ;;  %4761 = vmatprep.mubr.f32.mxu1 %v2967_v35  ;;  %v3293_v33 = vld [vmem:[#allocation4 + $0x2] sm:$0xff] }
 0x4c2   : > { %v2874_v41 = vpop.f32.mrf.mxu1  ;;  %4709 = vmatmul.mubr.f32.vlgmr.msra.gmra.mxu0 %v2991_v12  ;;  %4762 = vmatmul.mubr.f32.gmra.mxu1 %v2968_v37 }
 0x4c3   : > { %2980 = vst [vmem:[#allocation4 + $0x39] sm:$0xff] %v2970_v38  ;;  %v2969_v3 = vmul.f32 %v2946_v22, %v2899_v51  ;;  %v2902_v59 = vmax.f32 %v2892_v62, 0.0  ;;  %v2891_v4 = vadd.f32 %v2874_v41, %v2717_v46  ;;  %4771 = vmatpush3.msra.mxu0 %v5912_v7 }
 0x4c4   : > { %4772 = vmatprep.subr.mxu0 %v3861_v36  ;;  %v2992_v60 = vld [vmem:[#allocation4 + $0x10] sm:$0xff]  ;;  %v2993_v11 = vld [vmem:[#allocation4 + $0x18] sm:$0xff] }
 0x4c5   : > { %2979 = vst [vmem:[#allocation4 + $0x31] sm:$0xff] %v2969_v3  ;;  %v2972_v45 = vmul.f32 %v2961_v56, %v2902_v59  ;;  %v2901_v10 = vmax.f32 %v2891_v4, 0.0  ;;  %4773 = vmatpush3.msra.mxu0 %v3861_v36  ;;  %4711 = vmatprep.mubr.f32.mxu0 %v2992_v60  ;;  %v3294_v16 = vld [vmem:[#allocation4 + $0xa] sm:$0xff]  ;;  %v3295_v9 = vld [vmem:[#allocation4 + $0x12] sm:$0xff] }
 0x4c6   : > { %4774 = vmatprep.subr.mxu0 %v3860_v39  ;;  %4712 = vmatmul.mubr.f32.gmra.mxu0 %v2993_v11 }
 0x4c7   : > { %2982 = vst [vmem:[#allocation4 + $0x49] sm:$0x3f] %v2972_v45  ;;  %v2971_v7 = vmul.f32 %v2956_v63, %v2901_v10  ;;  %4775 = vmatpush3.msra.mxu0 %v3860_v39  ;;  %4764 = vmatprep.mubr.f32.mxu1 %v2969_v3  ;;  %v3830_v3 = vld [vmem:[%s6027_s12] ss:$0 sm:$0xff] }
 0x4c8   : > { %4776 = vmatprep.subr.mxu0 %v3859_v28  ;;  %v2994_v13 = vld [vmem:[#allocation4 + $0x20] sm:$0xff]  ;;  %v2995_v14 = vld [vmem:[#allocation4 + $0x28] sm:$0xff]  ;;  %4765 = vmatmul.mubr.f32.gmra.mxu1 %v2970_v38 }
 0x4c9   : > { %2981 = vst [vmem:[#allocation4 + $0x41] sm:$0xff] %v2971_v7  ;;  %4777 = vmatpush3.msra.mxu0 %v3859_v28  ;;  %4714 = vmatprep.mubr.f32.mxu0 %v2994_v13  ;;  %v3296_v42 = vld [vmem:[#allocation4 + $0x1a] sm:$0xff]  ;;  %v3297_v54 = vld [vmem:[#allocation4 + $0x22] sm:$0xff] }
 0x4ca   : > { %4778 = vmatprep.subr.mxu0 %v3858_v27  ;;  %4715 = vmatmul.mubr.f32.gmra.mxu0 %v2995_v14 }
 0x4cb   : > { %4779 = vmatpush3.msra.mxu0 %v3858_v27  ;;  %4767 = vmatprep.mubr.f32.mxu1 %v2971_v7 }
 0x4cc   : > { %4780 = vmatprep.subr.mxu0 %v3857_v15  ;;  %v2996_v31 = vld [vmem:[#allocation4 + $0x30] sm:$0xff]  ;;  %v2997_v34 = vld [vmem:[#allocation4 + $0x38] sm:$0xff] }
 0x4cd   : > { %4781 = vmatpush3.msra.mxu0 %v3857_v15  ;;  %4717 = vmatprep.mubr.f32.mxu0 %v2996_v31  ;;  %v3298_v8 = vld [vmem:[#allocation4 + $0x2a] sm:$0xff]  ;;  %v3299_v55 = vld [vmem:[#allocation4 + $0x32] sm:$0xff] }
 0x4ce   : > { %4782 = vmatprep.subr.mxu0 %v3856_v48  ;;  %4718 = vmatmul.mubr.f32.gmra.mxu0 %v2997_v34  ;;  %v3150_v58 = vld [vmem:[#allocation4 + $0x49] sm:$0x3f] }
 0x4cf   : > { %4783 = vmatpush3.msra.mxu0 %v3856_v48  ;;  %4768 = vmatmul.mubr.f32.gmra.mxu1 %v3150_v58  ;;  %v3302_v44 = vld [vmem:[#allocation4 + $0x4a] sm:$0x3f] }
 0x4d0   : > { %4784 = vmatprep.subr.mxu0 %v3855_v6  ;;  %v2998_v43 = vld [vmem:[#allocation4 + $0x40] sm:$0xff]  ;;  %v2999_v17 = vld [vmem:[#allocation4 + $0x48] sm:$0x3f]  ;;  %4837 = vmatprep.mubr.msk.f32.mxu1 %vm3463_vm3, %v3455_v52 }
 0x4d1   : > { %4785 = vmatpush3.msra.mxu0 %v3855_v6  ;;  %4720 = vmatprep.mubr.f32.mxu0 %v2998_v43  ;;  %v3300_v5 = vld [vmem:[#allocation4 + $0x3a] sm:$0xff]  ;;  %v3301_v30 = vld [vmem:[#allocation4 + $0x42] sm:$0xff] }
 0x4d2   : > { %4786 = vmatprep.subr.mxu0 %v3854_v18  ;;  %4721 = vmatmul.mubr.f32.gmra.mxu0 %v2999_v17 }
 0x4d3   : > { %4787 = vmatpush3.msra.mxu0 %v3854_v18  ;;  %4802 = vmatprep.mubr.f32.mxu0 %v3293_v33 }
 0x4d4   : > { %4788 = vmatprep.subr.mxu0 %v3853_v19 }
 0x4d5   : > { %4789 = vmatpush3.msra.mxu0 %v3853_v19 }
 0x4d6   : > { %4790 = vmatprep.subr.mxu0 %v3852_v61 }
 0x4d7   : > { %4791 = vmatpush3.msra.mxu0 %v3852_v61 }
 0x4d8   : > { %4792 = vmatprep.subr.mxu0 %v3851_v21 }
 0x4d9   : > { %4793 = vmatpush3.msra.mxu0 %v3851_v21 }
 0x4da   : > { %4794 = vmatprep.subr.mxu0 %v3850_v20 }
 0x4db   : > { %4795 = vmatpush3.msra.mxu0 %v3850_v20 }
 0x4dc   : > { %4796 = vmatprep.subr.mxu0 %v3849_v23 }
 0x4dd   : > { %4797 = vmatpush3.msra.mxu0 %v3849_v23 }
 0x4de   : > { %4798 = vmatprep.subr.mxu0 %v3848_v32 }
 0x4df   : > { %4799 = vmatpush3.msra.mxu0 %v3848_v32 }
 0x4e0   : > { %4800 = vmatprep.subr.mxu0 %v3847_v24 }
 0x4e1   : > { %4801 = vmatpush3.msra.mxu0 %v3847_v24 }
 0x4e2   : > { %4803 = vmatmul.mubr.f32.vlgmr.msra.gmra.mxu0 %v3294_v16 }
 0x4e3   : > { %4805 = vmatprep.mubr.f32.mxu0 %v3295_v9 }
 0x4e6   : > { %4806 = vmatmul.mubr.f32.gmra.mxu0 %v3296_v42 }
 0x4e7   : > { %4808 = vmatprep.mubr.f32.mxu0 %v3297_v54 }
 0x4ea   : > { %4809 = vmatmul.mubr.f32.gmra.mxu0 %v3298_v8 }
 0x4eb   : > { %4811 = vmatprep.mubr.f32.mxu0 %v3299_v55 }
 0x4ee   : > { %4812 = vmatmul.mubr.f32.gmra.mxu0 %v3300_v5 }
 0x4ef   : > { %4814 = vmatprep.mubr.f32.mxu0 %v3301_v30 }
 0x4f2   : > { %4815 = vmatmul.mubr.f32.gmra.mxu0 %v3302_v44 }
 0x57a   : > { %v5968_v0 = vpop.f32.mrf.mxu1 }
 0x57c   : > { %v5970_v26 = vpop.f32.mrf.mxu1 }
 0x57e   : > { %v4760_v35 = vpop.f32.mrf.mxu1 }
 0x580   : > { %v3244_v53 = vpop.f32.mrf.mxu1 }
 0x582   : > { %v4710_v57 = vpop.f32.mrf.mxu0  ;;  %v4763_v50 = vpop.f32.mrf.mxu1 }
 0x583   : > { %v3132_v24 = vadd.f32 %v4710_v57, %v3830_v3 }
 0x584   : > { %v3082_v2 = vpop.f32.mrf.mxu0  ;;  %v3254_v46 = vpop.f32.mrf.mxu1 }
 0x585   : > { %v3131_v54 = vadd.f32 %v3830_v3, %v3082_v2  ;;  %v3284_v30 = vadd.f32 %v5968_v0, %v3132_v24  ;;  %v3456_v0 = vld [vmem:[%s6028_s13 + $0x8] sm:$0xff] }
 0x586   : > { %v4713_v25 = vpop.f32.mrf.mxu0 }
 0x587   : > { %v3134_v17 = vadd.f32 %v4713_v25, %v3830_v3  ;;  %v3283_v25 = vadd.f32 %v5970_v26, %v3131_v54  ;;  %v3457_v26 = vld [vmem:[%s6028_s13 + $0x10] sm:$0xff] }
 0x588   : > { %v3092_v37 = vpop.f32.mrf.mxu0  ;;  %v4766_v62 = vpop.f32.mrf.mxu1 }
 0x589   : > { %v3133_v21 = vadd.f32 %v3830_v3, %v3092_v37  ;;  %v3286_v16 = vadd.f32 %v4760_v35, %v3134_v17  ;;  %v3458_v35 = vld [vmem:[%s6028_s13 + $0x18] sm:$0xff] }
 0x58a   : > { %v4716_v47 = vpop.f32.mrf.mxu0  ;;  %v3264_v59 = vpop.f32.mrf.mxu1 }
 0x58b   : > { %v3136_v13 = vadd.f32 %v4716_v47, %v3830_v3  ;;  %v3285_v8 = vadd.f32 %v3244_v53, %v3133_v21  ;;  %v3460_v53 = vld [vmem:[%s6028_s13 + $0x28] sm:$0xff] }
 0x58c   : > { %v3102_v49 = vpop.f32.mrf.mxu0 }
 0x58d   : > { %v3135_v31 = vadd.f32 %v3830_v3, %v3102_v49  ;;  %v3288_v19 = vadd.f32 %v4763_v50, %v3136_v13  ;;  %v3462_v50 = vld [vmem:[%s6028_s13 + $0x38] sm:$0xff] }
 0x58e   : > { %v4719_v40 = vpop.f32.mrf.mxu0 }
 0x58f   : > { %v4769_v56 = vpop.f32.mrf.mxu1  ;;  %v3138_v11 = vadd.f32 %v4719_v40, %v3830_v3  ;;  %v3287_v20 = vadd.f32 %v3254_v46, %v3135_v31 }
 0x590   : > { %v3112_v1 = vpop.f32.mrf.mxu0 }
 0x591   : > { %v3137_v28 = vadd.f32 %v3830_v3, %v3112_v1  ;;  %v3274_v7 = vpop.f32.mrf.mxu1  ;;  %v3290_v14 = vadd.f32 %v4766_v62, %v3138_v11  ;;  %v3459_v1 = vld [vmem:[%s6028_s13 + $0x20] sm:$0xff] }
 0x592   : > { %v4722_v22 = vpop.f32.mrf.mxu0 }
 0x593   : > { %v3140_v39 = vadd.f32 %v4722_v22, %v3830_v3  ;;  %v3289_v6 = vadd.f32 %v3264_v59, %v3137_v28  ;;  %v3461_v22 = vld [vmem:[%s6028_s13 + $0x30] sm:$0xff] }
 0x594   : > { %v3122_v29 = vpop.f32.mrf.mxu0 }
 0x595   : > { %v3139_v45 = vadd.f32 %v3830_v3, %v3122_v29  ;;  %v3292_v63 = vadd.f32 %v4769_v56, %v3140_v39 }
 0x597   : > { %v3291_v15 = vadd.f32 %v3274_v7, %v3139_v45 }
 0x5a2   : > { %v4804_v12 = vpop.f32.mrf.mxu0 }
 0x5a3   : > { %v3436_v57 = vadd.f32 %v4804_v12, %v3284_v30 }
 0x5a4   : > { %v3386_v38 = vpop.f32.mrf.mxu0 }
 0x5a5   : > { %v3435_v47 = vadd.f32 %v3386_v38, %v3283_v25  ;;  %v3446_v2 = vmax.f32 %v3436_v57, 0.0 }
 0x5a6   : > { %v4807_v51 = vpop.f32.mrf.mxu0 }
 0x5a7   : > { %v3438_v55 = vadd.f32 %v4807_v51, %v3286_v16  ;;  %v3445_v40 = vmax.f32 %v3435_v47, 0.0 }
 0x5a8   : > { %v3396_v36 = vpop.f32.mrf.mxu0 }
 0x5a9   : > { %v3437_v44 = vadd.f32 %v3396_v36, %v3285_v8  ;;  %v3448_v37 = vmax.f32 %v3438_v55, 0.0 }
 0x5aa   : > { %v4810_v41 = vpop.f32.mrf.mxu0 }
 0x5ab   : > { %v3440_v23 = vadd.f32 %v4810_v41, %v3288_v19  ;;  %v3447_v49 = vmax.f32 %v3437_v44, 0.0 }
 0x5ac   : > { %v3406_v4 = vpop.f32.mrf.mxu0 }
 0x5ad   : > { %v3439_v9 = vadd.f32 %v3406_v4, %v3287_v20  ;;  %v3450_v5 = vmax.f32 %v3440_v23, 0.0 }
 0x5ae   : > { %v4813_v60 = vpop.f32.mrf.mxu0 }
 0x5af   : > { %v3442_v58 = vadd.f32 %v4813_v60, %v3290_v14  ;;  %v3449_v52 = vmax.f32 %v3439_v9, 0.0 }
 0x5b0   : > { %v3416_v10 = vpop.f32.mrf.mxu0 }
 0x5b1   : > { %v3441_v33 = vadd.f32 %v3416_v10, %v3289_v6  ;;  %v3452_v32 = vmax.f32 %v3442_v58, 0.0 }
 0x5b2   : > { %v4816_v27 = vpop.f32.mrf.mxu0 }
 0x5b3   : > { %v3444_v48 = vadd.f32 %v4816_v27, %v3292_v63  ;;  %v3451_v42 = vmax.f32 %v3441_v33, 0.0 }
 0x5b4   : > { %v3426_v34 = vpop.f32.mrf.mxu0 }
 0x5b5   : > { %v3454_v18 = vmax.f32 %v3444_v48, 0.0  ;;  %v3443_v43 = vadd.f32 %v3426_v34, %v3291_v15 }
 0x5b7   : > { %v3453_v61 = vmax.f32 %v3443_v43, 0.0  ;;  %4817 = vmatprep.subr.msk.mxu1 %vm2105_vm2, %v3454_v18 }
 0x5b8   : > { %4818 = vmatpush3.msk.msra.mxu1 %vm2105_vm2, %v3454_v18 }
 0x5b9   : > { %4819 = vmatprep.subr.mxu1 %v3453_v61 }
 0x5ba   : > { %4820 = vmatpush3.msra.mxu1 %v3453_v61 }
 0x5bb   : > { %4821 = vmatprep.subr.mxu1 %v3452_v32 }
 0x5bc   : > { %4822 = vmatpush3.msra.mxu1 %v3452_v32 }
 0x5bd   : > { %4823 = vmatprep.subr.mxu1 %v3451_v42 }
 0x5be   : > { %4824 = vmatpush3.msra.mxu1 %v3451_v42 }
 0x5bf   : > { %4825 = vmatprep.subr.mxu1 %v3450_v5 }
 0x5c0   : > { %4826 = vmatpush3.msra.mxu1 %v3450_v5 }
 0x5c1   : > { %4827 = vmatprep.subr.mxu1 %v3449_v52 }
 0x5c2   : > { %4828 = vmatpush3.msra.mxu1 %v3449_v52 }
 0x5c3   : > { %4829 = vmatprep.subr.mxu1 %v3448_v37 }
 0x5c4   : > { %4830 = vmatpush3.msra.mxu1 %v3448_v37 }
 0x5c5   : > { %4831 = vmatprep.subr.mxu1 %v3447_v49 }
 0x5c6   : > { %4832 = vmatpush3.msra.mxu1 %v3447_v49 }
 0x5c7   : > { %4833 = vmatprep.subr.mxu1 %v3446_v2 }
 0x5c8   : > { %4834 = vmatpush3.msra.mxu1 %v3446_v2 }
 0x5c9   : > { %4835 = vmatprep.subr.mxu1 %v3445_v40 }
 0x5ca   : > { %4836 = vmatpush3.msra.mxu1 %v3445_v40 }
 0x5cb   : > { %4838 = vmatmul.mubr.msk.f32.vlgmr.msra.gmra.mxu1 %vm3463_vm3, %v3456_v0 }
 0x5cc   : > { %4840 = vmatprep.mubr.msk.f32.mxu1 %vm3463_vm3, %v3457_v26 }
 0x5cf   : > { %4841 = vmatmul.mubr.msk.f32.gmra.mxu1 %vm3463_vm3, %v3458_v35 }
 0x5d0   : > { %4843 = vmatprep.mubr.msk.f32.mxu1 %vm3463_vm3, %v3459_v1 }
 0x5d3   : > { %4844 = vmatmul.mubr.msk.f32.gmra.mxu1 %vm3463_vm3, %v3460_v53 }
 0x5d4   : > { %4846 = vmatprep.mubr.msk.f32.mxu1 %vm3463_vm3, %v3461_v22 }
 0x5d7   : > { %4847 = vmatmul.mubr.msk.f32.gmra.mxu1 %vm3463_vm3, %v3462_v50 }
 0x68b   : > { %v4839_v29 = vpop.f32.mrf.mxu1 }
 0x68c   : > { %3597 = vst [vmem:[%s469_s22 + $0x8] sm:$0xff] %v4839_v29 }
 0x68d   : > { %v3557_v12 = vpop.f32.mrf.mxu1 }
 0x68e   : > { %3596 = vst [vmem:[%s469_s22] sm:$0xff] %v3557_v12 }
 0x68f   : > { %v4842_v46 = vpop.f32.mrf.mxu1 }
 0x690   : > { %3599 = vst [vmem:[%s469_s22 + $0x18] sm:$0xff] %v4842_v46 }
 0x691   : > { %v3567_v38 = vpop.f32.mrf.mxu1 }
 0x692   : > { %3598 = vst [vmem:[%s469_s22 + $0x10] sm:$0xff] %v3567_v38 }
 0x693   : > { %v4845_v51 = vpop.f32.mrf.mxu1 }
 0x694   : > { %3601 = vst [vmem:[%s469_s22 + $0x28] sm:$0xff] %v4845_v51 }
 0x695   : > { %v3577_v62 = vpop.f32.mrf.mxu1 }
 0x696   : > { %3600 = vst [vmem:[%s469_s22 + $0x20] sm:$0xff] %v3577_v62 }
 0x697   : > { %v4848_v36 = vpop.f32.mrf.mxu1 }
 0x698   : > { %3603 = vst [vmem:[%s469_s22 + $0x38] sm:$0xff] %v4848_v36 }
 0x699   : > { %v3587_v41 = vpop.f32.mrf.mxu1 }
 0x69a   : > { %3602 = vst [vmem:[%s469_s22 + $0x30] sm:$0xff] %v3587_v41 }
 0x69b PF: > { %s24_s29 = sadd.s32 1, %s4867_s29  }
 0x69c   : > { %p21_p5 = scmp.ge.s32.totalorder %s24_s29, 4  }
 0x69e   :  { %23 = sbr.rel (!%p21_p5) target bundleno = 1 (0x1), region = 114 }

</bundles_post_ra>
